<compile_context>
chip_gen: v6e
topology: v6e:2x2x1
jax: 0.10.0
libtpu: 0.0.40
codegen_flags: <defaults>
</compile_context>

<pallas_src>
import jax
import jax.numpy as jnp
from jax import lax
from jax.experimental import pallas as pl
from jax.experimental.pallas import tpu as pltpu

NEG_SLOPE = 0.01  # nn.LeakyReLU default negative_slope


def _leaky_relu(x):
    return jnp.where(x >= 0, x, NEG_SLOPE * x)


def _down_kernel(x_ref, w1_ref, w2_ref, o_ref,
                 mp_pad, b_pad, a1_pad, col1, col2):
    # x_ref : (1, H, W, Cin)        input image (one batch element)
    # w1_ref: (9*Cin, Cmid)         conv1 weights, im2col layout (tap-major, ci-minor)
    # w2_ref: (9*Cmid, Cout)        conv2 weights, im2col layout
    # o_ref : (1, Ho, Wo, Cout)     output, Ho = H//2, Wo = W//2
    H, W, Cin = x_ref.shape[1], x_ref.shape[2], x_ref.shape[3]
    Ho, Wo, Cout = o_ref.shape[1], o_ref.shape[2], o_ref.shape[3]
    Cmid = w1_ref.shape[1]
    Hm, Wm = H - 1, W - 1
    wdt = w1_ref.dtype

    x = x_ref[0].astype(jnp.float32)                      # (H, W, Cin)

    # ---------------- MaxPool2d(kernel_size=2, stride=1) ----------------
    m = jnp.maximum(
        jnp.maximum(x[:-1, :-1, :], x[1:, :-1, :]),
        jnp.maximum(x[:-1, 1:, :], x[1:, 1:, :]))          # (Hm, Wm, Cin)

    # ------- reflect pad 1 into VMEM scratch (extra last row/col stays 0) -------
    mp_pad[...] = jnp.zeros_like(mp_pad)                   # (H+2, W+2, Cin)
    mp_pad[1:Hm + 1, 1:Wm + 1, :] = m
    mp_pad[0:1, 1:Wm + 1, :] = m[1:2, :, :]                # top    reflect
    mp_pad[Hm + 1:Hm + 2, 1:Wm + 1, :] = m[Hm - 2:Hm - 1, :, :]   # bottom reflect
    mp_pad[0:Hm + 2, 0:1, :] = mp_pad[0:Hm + 2, 2:3, :]    # left   reflect
    mp_pad[0:Hm + 2, Wm + 1:Wm + 2, :] = mp_pad[0:Hm + 2, Wm - 1:Wm, :]  # right reflect

    # ------- separable binomial blur, stride-2 positions only -------
    # horizontal pass ([1,2,1]) at stride-2 column phase, via strided reads
    pc_ev = mp_pad[:, pl.ds(0, Wo + 1, stride=2), :]       # padded cols 0,2,...,W
    pc_od = mp_pad[:, pl.ds(1, Wo, stride=2), :]           # padded cols 1,3,...,W-1
    hcols = pc_ev[:, 0:Wo, :] + 2.0 * pc_od + pc_ev[:, 1:Wo + 1, :]   # (H+2, Wo, Cin)
    # vertical pass ([1,2,1]) at stride-2 row phase, via leading-dim parity split
    hr = hcols.reshape((H + 2) // 2, 2, Wo, Cin)
    r_ev = hr[:, 0, :, :]                                  # padded rows 0,2,...,H
    r_od = hr[:, 1, :, :]                                  # padded rows 1,3,...,H+1
    blur = (r_ev[0:Ho] + 2.0 * r_od[0:Ho] + r_ev[1:Ho + 1]) * (1.0 / 16.0)  # (Ho, Wo, Cin)

    # ---------------- conv1: 3x3, pad 1, no bias -> LeakyReLU ----------------
    b_pad[...] = jnp.zeros_like(b_pad)                     # (Ho+2, Wo+2, Cin), zero pad
    b_pad[1:Ho + 1, 1:Wo + 1, :] = blur
    for di in range(3):
        for dj in range(3):
            t = di * 3 + dj
            col1[:, t * Cin:(t + 1) * Cin] = (
                b_pad[di:di + Ho, dj:dj + Wo, :].reshape(Ho * Wo, Cin))
    h1 = jnp.dot(col1[...].astype(wdt), w1_ref[...],
                 preferred_element_type=jnp.float32)       # (Ho*Wo, Cmid)
    h1 = _leaky_relu(h1)

    # ---------------- conv2: 3x3, pad 1, no bias -> LeakyReLU ----------------
    a1_pad[...] = jnp.zeros_like(a1_pad)                   # (Ho+2, Wo+2, Cmid)
    a1_pad[1:Ho + 1, 1:Wo + 1, :] = h1.reshape(Ho, Wo, Cmid)
    for di in range(3):
        for dj in range(3):
            t = di * 3 + dj
            col2[:, t * Cmid:(t + 1) * Cmid] = (
                a1_pad[di:di + Ho, dj:dj + Wo, :].reshape(Ho * Wo, Cmid))
    h2 = jnp.dot(col2[...].astype(wdt), w2_ref[...],
                 preferred_element_type=jnp.float32)       # (Ho*Wo, Cout)
    h2 = _leaky_relu(h2)

    o_ref[0] = h2.reshape(Ho, Wo, Cout).astype(o_ref.dtype)


def down_forward(x_nchw, w1_hwio, w2_hwio, *, compute_dtype=jnp.float32):
    """Down.forward. x: NCHW; w1/w2: HWIO (3,3,Cin,Cmid)/(3,3,Cmid,Cout); returns NCHW."""
    N, Cin, H, W = x_nchw.shape
    assert H % 2 == 0 and W % 2 == 0, "even spatial dims expected"
    Cmid = w1_hwio.shape[3]
    Cout = w2_hwio.shape[3]
    Ho, Wo = H // 2, W // 2

    x = jnp.transpose(x_nchw, (0, 2, 3, 1))                       # NCHW -> NHWC
    w1_2d = w1_hwio.reshape(9 * Cin, Cmid).astype(compute_dtype)  # im2col weight layout
    w2_2d = w2_hwio.reshape(9 * Cmid, Cout).astype(compute_dtype)

    out_nhwc = pl.pallas_call(
        _down_kernel,
        out_shape=jax.ShapeDtypeStruct((N, Ho, Wo, Cout), jnp.float32),
        grid=(N,),
        in_specs=[
            pl.BlockSpec((1, H, W, Cin), lambda n: (n, 0, 0, 0)),
            pl.BlockSpec((9 * Cin, Cmid), lambda n: (0, 0)),
            pl.BlockSpec((9 * Cmid, Cout), lambda n: (0, 0)),
        ],
        out_specs=pl.BlockSpec((1, Ho, Wo, Cout), lambda n: (n, 0, 0, 0)),
        scratch_shapes=[
            pltpu.VMEM((H + 2, W + 2, Cin), jnp.float32),      # reflect-padded maxpool
            pltpu.VMEM((Ho + 2, Wo + 2, Cin), jnp.float32),    # zero-padded blur
            pltpu.VMEM((Ho + 2, Wo + 2, Cmid), jnp.float32),   # zero-padded conv1 out
            pltpu.VMEM((Ho * Wo, 9 * Cin), jnp.float32),       # im2col for conv1
            pltpu.VMEM((Ho * Wo, 9 * Cmid), jnp.float32),      # im2col for conv2
        ],
        compiler_params=pltpu.CompilerParams(
            dimension_semantics=("parallel",),
            vmem_limit_bytes=32 * 1024 * 1024,
        ),
    )(x, w1_2d, w2_2d)

    return jnp.transpose(out_nhwc, (0, 3, 1, 2))                  # NHWC -> NCHW


# ---------------- pure-JAX reference for verification ----------------
def down_ref(x_nchw, w1, w2):
    x = jnp.transpose(x_nchw, (0, 2, 3, 1))
    m = lax.reduce_window(x, -jnp.inf, lax.max, (1, 2, 2, 1), (1, 1, 1, 1), "VALID")
    C = m.shape[-1]
    p = jnp.pad(m, ((0, 0), (1, 1), (1, 1), (0, 0)), mode="reflect")
    f1 = jnp.array([1.0, 2.0, 1.0], jnp.float32)
    filt = (f1[:, None] * f1[None, :]) / 16.0
    filt = jnp.tile(filt[:, :, None, None], (1, 1, 1, C))  # HWIO, I=1, O=C
    b = lax.conv_general_dilated(
        p, filt, (2, 2), "VALID",
        dimension_numbers=("NHWC", "HWIO", "NHWC"),
        feature_group_count=C)

    def conv(y, w):
        return lax.conv_general_dilated(
            y, w, (1, 1), ((1, 1), (1, 1)),
            dimension_numbers=("NHWC", "HWIO", "NHWC"))

    h = _leaky_relu(conv(b, w1))
    o = _leaky_relu(conv(h, w2))
    return jnp.transpose(o, (0, 3, 1, 2))


if __name__ == "__main__":
    key = jax.random.PRNGKey(0)
    kx, k1, k2 = jax.random.split(key, 3)

    N, Cin, H, W = 2, 4, 16, 16
    Cout = 8  # DoubleConv: mid_channels defaults to out_channels

    x_nchw = jax.random.normal(kx, (N, Cin, H, W), jnp.float32)
    # Synthetic weights (HWIO layout), no bias (bias=False in the module).
    w1 = 0.2 * jax.random.normal(k1, (3, 3, Cin, Cout), jnp.float32)
    w2 = 0.2 * jax.random.normal(k2, (3, 3, Cout, Cout), jnp.float32)

    ref = down_ref(x_nchw, w1, w2)

    # f32 path (exact check)
    out = jax.block_until_ready(down_forward(x_nchw, w1, w2))
    assert out.shape == (N, Cout, H // 2, W // 2), out.shape
    assert jnp.allclose(out, ref, atol=1e-4, rtol=1e-4), \
        float(jnp.max(jnp.abs(out - ref)))

    # bf16 MXU path (v6e/v7x-oriented); looser tolerance.
    out_bf16 = jax.block_until_ready(
        down_forward(x_nchw, w1, w2, compute_dtype=jnp.bfloat16))
    assert jnp.allclose(out_bf16, ref, atol=1e-1, rtol=1e-1), \
        float(jnp.max(jnp.abs(out_bf16 - ref)))

    print("KERNEL_OK")
</pallas_src>

<mosaic_0001>
module attributes {stable_mosaic.version = 11 : i64} {
  func.func @_down_kernel(%arg0: i32, %arg1: memref<1x16x16x4xf32, #tpu.memory_space<vmem>>, %arg2: memref<36x8xf32, #tpu.memory_space<vmem>>, %arg3: memref<72x8xf32, #tpu.memory_space<vmem>>, %arg4: memref<1x8x8x8xf32, #tpu.memory_space<vmem>>, %arg5: memref<18x18x4xf32, #tpu.memory_space<vmem>>, %arg6: memref<10x10x4xf32, #tpu.memory_space<vmem>>, %arg7: memref<10x10x8xf32, #tpu.memory_space<vmem>>, %arg8: memref<64x36xf32, #tpu.memory_space<vmem>>, %arg9: memref<64x72xf32, #tpu.memory_space<vmem>>) attributes {dimension_semantics = [#tpu.dimension_semantics<parallel>], iteration_bounds = array<i64: 2>, scalar_prefetch = 0 : i64, scratch_operands = 5 : i64, tpu.core_type = #tpu.core_type<tc>, window_params = [{transform_indices = @transform_0, window_bounds = array<i64: 1, 16, 16, 4>}, {pipeline_mode = #tpu.pipeline_mode<synchronous>, transform_indices = @transform_1, window_bounds = array<i64: 36, 8>}, {pipeline_mode = #tpu.pipeline_mode<synchronous>, transform_indices = @transform_2, window_bounds = array<i64: 72, 8>}, {transform_indices = @transform_3, window_bounds = array<i64: 1, 8, 8, 8>}]} {
    %c0 = arith.constant 0 : index
    %c0_0 = arith.constant 0 : index
    %c0_1 = arith.constant 0 : index
    %c0_2 = arith.constant 0 : index
    %0 = vector.load %arg1[%c0, %c0_0, %c0_1, %c0_2] : memref<1x16x16x4xf32, #tpu.memory_space<vmem>>, vector<1x16x16x4xf32>
    %1 = vector.shape_cast %0 : vector<1x16x16x4xf32> to vector<16x16x4xf32>
    %2 = vector.extract_strided_slice %1 {offsets = [0, 0, 0], sizes = [15, 15, 4], strides = [1, 1, 1]} : vector<16x16x4xf32> to vector<15x15x4xf32>
    %3 = vector.extract_strided_slice %1 {offsets = [1, 0, 0], sizes = [15, 15, 4], strides = [1, 1, 1]} : vector<16x16x4xf32> to vector<15x15x4xf32>
    %4 = arith.maximumf %2, %3 : vector<15x15x4xf32>
    %5 = vector.extract_strided_slice %1 {offsets = [0, 1, 0], sizes = [15, 15, 4], strides = [1, 1, 1]} : vector<16x16x4xf32> to vector<15x15x4xf32>
    %6 = vector.extract_strided_slice %1 {offsets = [1, 1, 0], sizes = [15, 15, 4], strides = [1, 1, 1]} : vector<16x16x4xf32> to vector<15x15x4xf32>
    %7 = arith.maximumf %5, %6 : vector<15x15x4xf32>
    %8 = arith.maximumf %4, %7 : vector<15x15x4xf32>
    %cst = arith.constant 0.000000e+00 : f32
    %9 = vector.broadcast %cst : f32 to vector<18x18x4xf32>
    %c0_3 = arith.constant 0 : index
    %c0_4 = arith.constant 0 : index
    %c0_5 = arith.constant 0 : index
    %10 = vector.load %arg5[%c0_3, %c0_4, %c0_5] : memref<18x18x4xf32, #tpu.memory_space<vmem>>, vector<18x18x4xf32>
    tpu.vector_store %arg5[%c0_3, %c0_4, %c0_5], %9 {strides = array<i32>} : memref<18x18x4xf32, #tpu.memory_space<vmem>>, vector<18x18x4xf32>,
    %c1 = arith.constant 1 : index
    %c1_6 = arith.constant 1 : index
    %c0_7 = arith.constant 0 : index
    %11 = vector.load %arg5[%c1, %c1_6, %c0_7] : memref<18x18x4xf32, #tpu.memory_space<vmem>>, vector<15x15x4xf32>
    tpu.vector_store %arg5[%c1, %c1_6, %c0_7], %8 {strides = array<i32>} : memref<18x18x4xf32, #tpu.memory_space<vmem>>, vector<15x15x4xf32>,
    %12 = vector.extract_strided_slice %8 {offsets = [1, 0, 0], sizes = [1, 15, 4], strides = [1, 1, 1]} : vector<15x15x4xf32> to vector<1x15x4xf32>
    %c0_8 = arith.constant 0 : index
    %c1_9 = arith.constant 1 : index
    %c0_10 = arith.constant 0 : index
    %13 = vector.load %arg5[%c0_8, %c1_9, %c0_10] : memref<18x18x4xf32, #tpu.memory_space<vmem>>, vector<1x15x4xf32>
    tpu.vector_store %arg5[%c0_8, %c1_9, %c0_10], %12 {strides = array<i32>} : memref<18x18x4xf32, #tpu.memory_space<vmem>>, vector<1x15x4xf32>,
    %14 = vector.extract_strided_slice %8 {offsets = [13, 0, 0], sizes = [1, 15, 4], strides = [1, 1, 1]} : vector<15x15x4xf32> to vector<1x15x4xf32>
    %c16 = arith.constant 16 : index
    %c1_11 = arith.constant 1 : index
    %c0_12 = arith.constant 0 : index
    %15 = vector.load %arg5[%c16, %c1_11, %c0_12] : memref<18x18x4xf32, #tpu.memory_space<vmem>>, vector<1x15x4xf32>
    tpu.vector_store %arg5[%c16, %c1_11, %c0_12], %14 {strides = array<i32>} : memref<18x18x4xf32, #tpu.memory_space<vmem>>, vector<1x15x4xf32>,
    %c0_13 = arith.constant 0 : index
    %c2 = arith.constant 2 : index
    %c0_14 = arith.constant 0 : index
    %16 = vector.load %arg5[%c0_13, %c2, %c0_14] : memref<18x18x4xf32, #tpu.memory_space<vmem>>, vector<17x1x4xf32>
    %c0_15 = arith.constant 0 : index
    %c0_16 = arith.constant 0 : index
    %c0_17 = arith.constant 0 : index
    %17 = vector.load %arg5[%c0_15, %c0_16, %c0_17] : memref<18x18x4xf32, #tpu.memory_space<vmem>>, vector<17x1x4xf32>
    tpu.vector_store %arg5[%c0_15, %c0_16, %c0_17], %16 {strides = array<i32>} : memref<18x18x4xf32, #tpu.memory_space<vmem>>, vector<17x1x4xf32>,
    %c0_18 = arith.constant 0 : index
    %c14 = arith.constant 14 : index
    %c0_19 = arith.constant 0 : index
    %18 = vector.load %arg5[%c0_18, %c14, %c0_19] : memref<18x18x4xf32, #tpu.memory_space<vmem>>, vector<17x1x4xf32>
    %c0_20 = arith.constant 0 : index
    %c16_21 = arith.constant 16 : index
    %c0_22 = arith.constant 0 : index
    %19 = vector.load %arg5[%c0_20, %c16_21, %c0_22] : memref<18x18x4xf32, #tpu.memory_space<vmem>>, vector<17x1x4xf32>
    tpu.vector_store %arg5[%c0_20, %c16_21, %c0_22], %18 {strides = array<i32>} : memref<18x18x4xf32, #tpu.memory_space<vmem>>, vector<17x1x4xf32>,
    %c0_23 = arith.constant 0 : index
    %c0_24 = arith.constant 0 : index
    %c0_25 = arith.constant 0 : index
    %20 = tpu.strided_load %arg5[%c0_23, %c0_24, %c0_25] {strides = array<i32: 1, 2, 1>} : memref<18x18x4xf32, #tpu.memory_space<vmem>>, vector<18x9x4xf32>
    %c0_26 = arith.constant 0 : index
    %c1_27 = arith.constant 1 : index
    %c0_28 = arith.constant 0 : index
    %21 = tpu.strided_load %arg5[%c0_26, %c1_27, %c0_28] {strides = array<i32: 1, 2, 1>} : memref<18x18x4xf32, #tpu.memory_space<vmem>>, vector<18x8x4xf32>
    %22 = vector.extract_strided_slice %20 {offsets = [0, 0, 0], sizes = [18, 8, 4], strides = [1, 1, 1]} : vector<18x9x4xf32> to vector<18x8x4xf32>
    %cst_29 = arith.constant 2.000000e+00 : f32
    %23 = vector.broadcast %cst_29 : f32 to vector<18x8x4xf32>
    %24 = arith.mulf %23, %21 : vector<18x8x4xf32>
    %25 = arith.addf %22, %24 : vector<18x8x4xf32>
    %26 = vector.extract_strided_slice %20 {offsets = [0, 1, 0], sizes = [18, 8, 4], strides = [1, 1, 1]} : vector<18x9x4xf32> to vector<18x8x4xf32>
    %27 = arith.addf %25, %26 : vector<18x8x4xf32>
    %28 = vector.shape_cast %27 : vector<18x8x4xf32> to vector<9x2x8x4xf32>
    %29 = vector.extract_strided_slice %28 {offsets = [0, 0, 0, 0], sizes = [9, 1, 8, 4], strides = [1, 1, 1, 1]} : vector<9x2x8x4xf32> to vector<9x1x8x4xf32>
    %30 = vector.shape_cast %29 : vector<9x1x8x4xf32> to vector<9x8x4xf32>
    %31 = vector.extract_strided_slice %28 {offsets = [0, 1, 0, 0], sizes = [9, 1, 8, 4], strides = [1, 1, 1, 1]} : vector<9x2x8x4xf32> to vector<9x1x8x4xf32>
    %32 = vector.shape_cast %31 : vector<9x1x8x4xf32> to vector<9x8x4xf32>
    %33 = vector.extract_strided_slice %30 {offsets = [0, 0, 0], sizes = [8, 8, 4], strides = [1, 1, 1]} : vector<9x8x4xf32> to vector<8x8x4xf32>
    %34 = vector.extract_strided_slice %32 {offsets = [0, 0, 0], sizes = [8, 8, 4], strides = [1, 1, 1]} : vector<9x8x4xf32> to vector<8x8x4xf32>
    %cst_30 = arith.constant 2.000000e+00 : f32
    %35 = vector.broadcast %cst_30 : f32 to vector<8x8x4xf32>
    %36 = arith.mulf %35, %34 : vector<8x8x4xf32>
    %37 = arith.addf %33, %36 : vector<8x8x4xf32>
    %38 = vector.extract_strided_slice %30 {offsets = [1, 0, 0], sizes = [8, 8, 4], strides = [1, 1, 1]} : vector<9x8x4xf32> to vector<8x8x4xf32>
    %39 = arith.addf %37, %38 : vector<8x8x4xf32>
    %cst_31 = arith.constant 6.250000e-02 : f32
    %40 = vector.broadcast %cst_31 : f32 to vector<8x8x4xf32>
    %41 = arith.mulf %39, %40 : vector<8x8x4xf32>
    %cst_32 = arith.constant 0.000000e+00 : f32
    %42 = vector.broadcast %cst_32 : f32 to vector<10x10x4xf32>
    %c0_33 = arith.constant 0 : index
    %c0_34 = arith.constant 0 : index
    %c0_35 = arith.constant 0 : index
    %43 = vector.load %arg6[%c0_33, %c0_34, %c0_35] : memref<10x10x4xf32, #tpu.memory_space<vmem>>, vector<10x10x4xf32>
    tpu.vector_store %arg6[%c0_33, %c0_34, %c0_35], %42 {strides = array<i32>} : memref<10x10x4xf32, #tpu.memory_space<vmem>>, vector<10x10x4xf32>,
    %c1_36 = arith.constant 1 : index
    %c1_37 = arith.constant 1 : index
    %c0_38 = arith.constant 0 : index
    %44 = vector.load %arg6[%c1_36, %c1_37, %c0_38] : memref<10x10x4xf32, #tpu.memory_space<vmem>>, vector<8x8x4xf32>
    tpu.vector_store %arg6[%c1_36, %c1_37, %c0_38], %41 {strides = array<i32>} : memref<10x10x4xf32, #tpu.memory_space<vmem>>, vector<8x8x4xf32>,
    %c0_39 = arith.constant 0 : index
    %c0_40 = arith.constant 0 : index
    %c0_41 = arith.constant 0 : index
    %45 = vector.load %arg6[%c0_39, %c0_40, %c0_41] : memref<10x10x4xf32, #tpu.memory_space<vmem>>, vector<8x8x4xf32>
    %46 = vector.shape_cast %45 : vector<8x8x4xf32> to vector<64x4xf32>
    %c0_42 = arith.constant 0 : index
    %c0_43 = arith.constant 0 : index
    %47 = vector.load %arg8[%c0_42, %c0_43] : memref<64x36xf32, #tpu.memory_space<vmem>>, vector<64x4xf32>
    tpu.vector_store %arg8[%c0_42, %c0_43], %46 {strides = array<i32>} : memref<64x36xf32, #tpu.memory_space<vmem>>, vector<64x4xf32>,
    %c0_44 = arith.constant 0 : index
    %c1_45 = arith.constant 1 : index
    %c0_46 = arith.constant 0 : index
    %48 = vector.load %arg6[%c0_44, %c1_45, %c0_46] : memref<10x10x4xf32, #tpu.memory_space<vmem>>, vector<8x8x4xf32>
    %49 = vector.shape_cast %48 : vector<8x8x4xf32> to vector<64x4xf32>
    %c0_47 = arith.constant 0 : index
    %c4 = arith.constant 4 : index
    %50 = vector.load %arg8[%c0_47, %c4] : memref<64x36xf32, #tpu.memory_space<vmem>>, vector<64x4xf32>
    tpu.vector_store %arg8[%c0_47, %c4], %49 {strides = array<i32>} : memref<64x36xf32, #tpu.memory_space<vmem>>, vector<64x4xf32>,
    %c0_48 = arith.constant 0 : index
    %c2_49 = arith.constant 2 : index
    %c0_50 = arith.constant 0 : index
    %51 = vector.load %arg6[%c0_48, %c2_49, %c0_50] : memref<10x10x4xf32, #tpu.memory_space<vmem>>, vector<8x8x4xf32>
    %52 = vector.shape_cast %51 : vector<8x8x4xf32> to vector<64x4xf32>
    %c0_51 = arith.constant 0 : index
    %c8 = arith.constant 8 : index
    %53 = vector.load %arg8[%c0_51, %c8] : memref<64x36xf32, #tpu.memory_space<vmem>>, vector<64x4xf32>
    tpu.vector_store %arg8[%c0_51, %c8], %52 {strides = array<i32>} : memref<64x36xf32, #tpu.memory_space<vmem>>, vector<64x4xf32>,
    %c1_52 = arith.constant 1 : index
    %c0_53 = arith.constant 0 : index
    %c0_54 = arith.constant 0 : index
    %54 = vector.load %arg6[%c1_52, %c0_53, %c0_54] : memref<10x10x4xf32, #tpu.memory_space<vmem>>, vector<8x8x4xf32>
    %55 = vector.shape_cast %54 : vector<8x8x4xf32> to vector<64x4xf32>
    %c0_55 = arith.constant 0 : index
    %c12 = arith.constant 12 : index
    %56 = vector.load %arg8[%c0_55, %c12] : memref<64x36xf32, #tpu.memory_space<vmem>>, vector<64x4xf32>
    tpu.vector_store %arg8[%c0_55, %c12], %55 {strides = array<i32>} : memref<64x36xf32, #tpu.memory_space<vmem>>, vector<64x4xf32>,
    %c1_56 = arith.constant 1 : index
    %c1_57 = arith.constant 1 : index
    %c0_58 = arith.constant 0 : index
    %57 = vector.load %arg6[%c1_56, %c1_57, %c0_58] : memref<10x10x4xf32, #tpu.memory_space<vmem>>, vector<8x8x4xf32>
    %58 = vector.shape_cast %57 : vector<8x8x4xf32> to vector<64x4xf32>
    %c0_59 = arith.constant 0 : index
    %c16_60 = arith.constant 16 : index
    %59 = vector.load %arg8[%c0_59, %c16_60] : memref<64x36xf32, #tpu.memory_space<vmem>>, vector<64x4xf32>
    tpu.vector_store %arg8[%c0_59, %c16_60], %58 {strides = array<i32>} : memref<64x36xf32, #tpu.memory_space<vmem>>, vector<64x4xf32>,
    %c1_61 = arith.constant 1 : index
    %c2_62 = arith.constant 2 : index
    %c0_63 = arith.constant 0 : index
    %60 = vector.load %arg6[%c1_61, %c2_62, %c0_63] : memref<10x10x4xf32, #tpu.memory_space<vmem>>, vector<8x8x4xf32>
    %61 = vector.shape_cast %60 : vector<8x8x4xf32> to vector<64x4xf32>
    %c0_64 = arith.constant 0 : index
    %c20 = arith.constant 20 : index
    %62 = vector.load %arg8[%c0_64, %c20] : memref<64x36xf32, #tpu.memory_space<vmem>>, vector<64x4xf32>
    tpu.vector_store %arg8[%c0_64, %c20], %61 {strides = array<i32>} : memref<64x36xf32, #tpu.memory_space<vmem>>, vector<64x4xf32>,
    %c2_65 = arith.constant 2 : index
    %c0_66 = arith.constant 0 : index
    %c0_67 = arith.constant 0 : index
    %63 = vector.load %arg6[%c2_65, %c0_66, %c0_67] : memref<10x10x4xf32, #tpu.memory_space<vmem>>, vector<8x8x4xf32>
    %64 = vector.shape_cast %63 : vector<8x8x4xf32> to vector<64x4xf32>
    %c0_68 = arith.constant 0 : index
    %c24 = arith.constant 24 : index
    %65 = vector.load %arg8[%c0_68, %c24] : memref<64x36xf32, #tpu.memory_space<vmem>>, vector<64x4xf32>
    tpu.vector_store %arg8[%c0_68, %c24], %64 {strides = array<i32>} : memref<64x36xf32, #tpu.memory_space<vmem>>, vector<64x4xf32>,
    %c2_69 = arith.constant 2 : index
    %c1_70 = arith.constant 1 : index
    %c0_71 = arith.constant 0 : index
    %66 = vector.load %arg6[%c2_69, %c1_70, %c0_71] : memref<10x10x4xf32, #tpu.memory_space<vmem>>, vector<8x8x4xf32>
    %67 = vector.shape_cast %66 : vector<8x8x4xf32> to vector<64x4xf32>
    %c0_72 = arith.constant 0 : index
    %c28 = arith.constant 28 : index
    %68 = vector.load %arg8[%c0_72, %c28] : memref<64x36xf32, #tpu.memory_space<vmem>>, vector<64x4xf32>
    tpu.vector_store %arg8[%c0_72, %c28], %67 {strides = array<i32>} : memref<64x36xf32, #tpu.memory_space<vmem>>, vector<64x4xf32>,
    %c2_73 = arith.constant 2 : index
    %c2_74 = arith.constant 2 : index
    %c0_75 = arith.constant 0 : index
    %69 = vector.load %arg6[%c2_73, %c2_74, %c0_75] : memref<10x10x4xf32, #tpu.memory_space<vmem>>, vector<8x8x4xf32>
    %70 = vector.shape_cast %69 : vector<8x8x4xf32> to vector<64x4xf32>
    %c0_76 = arith.constant 0 : index
    %c32 = arith.constant 32 : index
    %71 = vector.load %arg8[%c0_76, %c32] : memref<64x36xf32, #tpu.memory_space<vmem>>, vector<64x4xf32>
    tpu.vector_store %arg8[%c0_76, %c32], %70 {strides = array<i32>} : memref<64x36xf32, #tpu.memory_space<vmem>>, vector<64x4xf32>,
    %c0_77 = arith.constant 0 : index
    %c0_78 = arith.constant 0 : index
    %72 = vector.load %arg8[%c0_77, %c0_78] : memref<64x36xf32, #tpu.memory_space<vmem>>, vector<64x36xf32>
    %c0_79 = arith.constant 0 : index
    %c0_80 = arith.constant 0 : index
    %73 = vector.load %arg2[%c0_79, %c0_80] : memref<36x8xf32, #tpu.memory_space<vmem>>, vector<36x8xf32>
    %cst_81 = arith.constant dense<0.000000e+00> : vector<64x8xf32>
    %74 = tpu.matmul %72, %73, %cst_81 {dimension_numbers = #tpu.dot_dimension_numbers<[1], [0], [0], [1], [0, 0, 1, 1], [], []>} : vector<64x36xf32>, vector<36x8xf32>, vector<64x8xf32> -> vector<64x8xf32>
    %cst_82 = arith.constant 0.000000e+00 : f32
    %75 = vector.broadcast %cst_82 : f32 to vector<64x8xf32>
    %76 = arith.cmpf oge, %74, %75 : vector<64x8xf32>
    %cst_83 = arith.constant 0.00999999977 : f32
    %77 = vector.broadcast %cst_83 : f32 to vector<64x8xf32>
    %78 = arith.mulf %77, %74 : vector<64x8xf32>
    %79 = arith.select %76, %74, %78 : vector<64x8xi1>, vector<64x8xf32>
    %cst_84 = arith.constant 0.000000e+00 : f32
    %80 = vector.broadcast %cst_84 : f32 to vector<10x10x8xf32>
    %c0_85 = arith.constant 0 : index
    %c0_86 = arith.constant 0 : index
    %c0_87 = arith.constant 0 : index
    %81 = vector.load %arg7[%c0_85, %c0_86, %c0_87] : memref<10x10x8xf32, #tpu.memory_space<vmem>>, vector<10x10x8xf32>
    tpu.vector_store %arg7[%c0_85, %c0_86, %c0_87], %80 {strides = array<i32>} : memref<10x10x8xf32, #tpu.memory_space<vmem>>, vector<10x10x8xf32>,
    %82 = vector.shape_cast %79 : vector<64x8xf32> to vector<8x8x8xf32>
    %c1_88 = arith.constant 1 : index
    %c1_89 = arith.constant 1 : index
    %c0_90 = arith.constant 0 : index
    %83 = vector.load %arg7[%c1_88, %c1_89, %c0_90] : memref<10x10x8xf32, #tpu.memory_space<vmem>>, vector<8x8x8xf32>
    tpu.vector_store %arg7[%c1_88, %c1_89, %c0_90], %82 {strides = array<i32>} : memref<10x10x8xf32, #tpu.memory_space<vmem>>, vector<8x8x8xf32>,
    %c0_91 = arith.constant 0 : index
    %c0_92 = arith.constant 0 : index
    %c0_93 = arith.constant 0 : index
    %84 = vector.load %arg7[%c0_91, %c0_92, %c0_93] : memref<10x10x8xf32, #tpu.memory_space<vmem>>, vector<8x8x8xf32>
    %85 = vector.shape_cast %84 : vector<8x8x8xf32> to vector<64x8xf32>
    %c0_94 = arith.constant 0 : index
    %c0_95 = arith.constant 0 : index
    %86 = vector.load %arg9[%c0_94, %c0_95] : memref<64x72xf32, #tpu.memory_space<vmem>>, vector<64x8xf32>
    tpu.vector_store %arg9[%c0_94, %c0_95], %85 {strides = array<i32>} : memref<64x72xf32, #tpu.memory_space<vmem>>, vector<64x8xf32>,
    %c0_96 = arith.constant 0 : index
    %c1_97 = arith.constant 1 : index
    %c0_98 = arith.constant 0 : index
    %87 = vector.load %arg7[%c0_96, %c1_97, %c0_98] : memref<10x10x8xf32, #tpu.memory_space<vmem>>, vector<8x8x8xf32>
    %88 = vector.shape_cast %87 : vector<8x8x8xf32> to vector<64x8xf32>
    %c0_99 = arith.constant 0 : index
    %c8_100 = arith.constant 8 : index
    %89 = vector.load %arg9[%c0_99, %c8_100] : memref<64x72xf32, #tpu.memory_space<vmem>>, vector<64x8xf32>
    tpu.vector_store %arg9[%c0_99, %c8_100], %88 {strides = array<i32>} : memref<64x72xf32, #tpu.memory_space<vmem>>, vector<64x8xf32>,
    %c0_101 = arith.constant 0 : index
    %c2_102 = arith.constant 2 : index
    %c0_103 = arith.constant 0 : index
    %90 = vector.load %arg7[%c0_101, %c2_102, %c0_103] : memref<10x10x8xf32, #tpu.memory_space<vmem>>, vector<8x8x8xf32>
    %91 = vector.shape_cast %90 : vector<8x8x8xf32> to vector<64x8xf32>
    %c0_104 = arith.constant 0 : index
    %c16_105 = arith.constant 16 : index
    %92 = vector.load %arg9[%c0_104, %c16_105] : memref<64x72xf32, #tpu.memory_space<vmem>>, vector<64x8xf32>
    tpu.vector_store %arg9[%c0_104, %c16_105], %91 {strides = array<i32>} : memref<64x72xf32, #tpu.memory_space<vmem>>, vector<64x8xf32>,
    %c1_106 = arith.constant 1 : index
    %c0_107 = arith.constant 0 : index
    %c0_108 = arith.constant 0 : index
    %93 = vector.load %arg7[%c1_106, %c0_107, %c0_108] : memref<10x10x8xf32, #tpu.memory_space<vmem>>, vector<8x8x8xf32>
    %94 = vector.shape_cast %93 : vector<8x8x8xf32> to vector<64x8xf32>
    %c0_109 = arith.constant 0 : index
    %c24_110 = arith.constant 24 : index
    %95 = vector.load %arg9[%c0_109, %c24_110] : memref<64x72xf32, #tpu.memory_space<vmem>>, vector<64x8xf32>
    tpu.vector_store %arg9[%c0_109, %c24_110], %94 {strides = array<i32>} : memref<64x72xf32, #tpu.memory_space<vmem>>, vector<64x8xf32>,
    %c1_111 = arith.constant 1 : index
    %c1_112 = arith.constant 1 : index
    %c0_113 = arith.constant 0 : index
    %96 = vector.load %arg7[%c1_111, %c1_112, %c0_113] : memref<10x10x8xf32, #tpu.memory_space<vmem>>, vector<8x8x8xf32>
    %97 = vector.shape_cast %96 : vector<8x8x8xf32> to vector<64x8xf32>
    %c0_114 = arith.constant 0 : index
    %c32_115 = arith.constant 32 : index
    %98 = vector.load %arg9[%c0_114, %c32_115] : memref<64x72xf32, #tpu.memory_space<vmem>>, vector<64x8xf32>
    tpu.vector_store %arg9[%c0_114, %c32_115], %97 {strides = array<i32>} : memref<64x72xf32, #tpu.memory_space<vmem>>, vector<64x8xf32>,
    %c1_116 = arith.constant 1 : index
    %c2_117 = arith.constant 2 : index
    %c0_118 = arith.constant 0 : index
    %99 = vector.load %arg7[%c1_116, %c2_117, %c0_118] : memref<10x10x8xf32, #tpu.memory_space<vmem>>, vector<8x8x8xf32>
    %100 = vector.shape_cast %99 : vector<8x8x8xf32> to vector<64x8xf32>
    %c0_119 = arith.constant 0 : index
    %c40 = arith.constant 40 : index
    %101 = vector.load %arg9[%c0_119, %c40] : memref<64x72xf32, #tpu.memory_space<vmem>>, vector<64x8xf32>
    tpu.vector_store %arg9[%c0_119, %c40], %100 {strides = array<i32>} : memref<64x72xf32, #tpu.memory_space<vmem>>, vector<64x8xf32>,
    %c2_120 = arith.constant 2 : index
    %c0_121 = arith.constant 0 : index
    %c0_122 = arith.constant 0 : index
    %102 = vector.load %arg7[%c2_120, %c0_121, %c0_122] : memref<10x10x8xf32, #tpu.memory_space<vmem>>, vector<8x8x8xf32>
    %103 = vector.shape_cast %102 : vector<8x8x8xf32> to vector<64x8xf32>
    %c0_123 = arith.constant 0 : index
    %c48 = arith.constant 48 : index
    %104 = vector.load %arg9[%c0_123, %c48] : memref<64x72xf32, #tpu.memory_space<vmem>>, vector<64x8xf32>
    tpu.vector_store %arg9[%c0_123, %c48], %103 {strides = array<i32>} : memref<64x72xf32, #tpu.memory_space<vmem>>, vector<64x8xf32>,
    %c2_124 = arith.constant 2 : index
    %c1_125 = arith.constant 1 : index
    %c0_126 = arith.constant 0 : index
    %105 = vector.load %arg7[%c2_124, %c1_125, %c0_126] : memref<10x10x8xf32, #tpu.memory_space<vmem>>, vector<8x8x8xf32>
    %106 = vector.shape_cast %105 : vector<8x8x8xf32> to vector<64x8xf32>
    %c0_127 = arith.constant 0 : index
    %c56 = arith.constant 56 : index
    %107 = vector.load %arg9[%c0_127, %c56] : memref<64x72xf32, #tpu.memory_space<vmem>>, vector<64x8xf32>
    tpu.vector_store %arg9[%c0_127, %c56], %106 {strides = array<i32>} : memref<64x72xf32, #tpu.memory_space<vmem>>, vector<64x8xf32>,
    %c2_128 = arith.constant 2 : index
    %c2_129 = arith.constant 2 : index
    %c0_130 = arith.constant 0 : index
    %108 = vector.load %arg7[%c2_128, %c2_129, %c0_130] : memref<10x10x8xf32, #tpu.memory_space<vmem>>, vector<8x8x8xf32>
    %109 = vector.shape_cast %108 : vector<8x8x8xf32> to vector<64x8xf32>
    %c0_131 = arith.constant 0 : index
    %c64 = arith.constant 64 : index
    %110 = vector.load %arg9[%c0_131, %c64] : memref<64x72xf32, #tpu.memory_space<vmem>>, vector<64x8xf32>
    tpu.vector_store %arg9[%c0_131, %c64], %109 {strides = array<i32>} : memref<64x72xf32, #tpu.memory_space<vmem>>, vector<64x8xf32>,
    %c0_132 = arith.constant 0 : index
    %c0_133 = arith.constant 0 : index
    %111 = vector.load %arg9[%c0_132, %c0_133] : memref<64x72xf32, #tpu.memory_space<vmem>>, vector<64x72xf32>
    %c0_134 = arith.constant 0 : index
    %c0_135 = arith.constant 0 : index
    %112 = vector.load %arg3[%c0_134, %c0_135] : memref<72x8xf32, #tpu.memory_space<vmem>>, vector<72x8xf32>
    %cst_136 = arith.constant dense<0.000000e+00> : vector<64x8xf32>
    %113 = tpu.matmul %111, %112, %cst_136 {dimension_numbers = #tpu.dot_dimension_numbers<[1], [0], [0], [1], [0, 0, 1, 1], [], []>} : vector<64x72xf32>, vector<72x8xf32>, vector<64x8xf32> -> vector<64x8xf32>
    %cst_137 = arith.constant 0.000000e+00 : f32
    %114 = vector.broadcast %cst_137 : f32 to vector<64x8xf32>
    %115 = arith.cmpf oge, %113, %114 : vector<64x8xf32>
    %cst_138 = arith.constant 0.00999999977 : f32
    %116 = vector.broadcast %cst_138 : f32 to vector<64x8xf32>
    %117 = arith.mulf %116, %113 : vector<64x8xf32>
    %118 = arith.select %115, %113, %117 : vector<64x8xi1>, vector<64x8xf32>
    %119 = vector.shape_cast %118 : vector<64x8xf32> to vector<8x8x8xf32>
    %c0_139 = arith.constant 0 : index
    %c0_140 = arith.constant 0 : index
    %c0_141 = arith.constant 0 : index
    %c0_142 = arith.constant 0 : index
    %120 = vector.load %arg4[%c0_139, %c0_140, %c0_141, %c0_142] : memref<1x8x8x8xf32, #tpu.memory_space<vmem>>, vector<1x8x8x8xf32>
    %121 = vector.shape_cast %120 : vector<1x8x8x8xf32> to vector<8x8x8xf32>
    %122 = vector.shape_cast %119 : vector<8x8x8xf32> to vector<1x8x8x8xf32>
    tpu.vector_store %arg4[%c0_139, %c0_140, %c0_141, %c0_142], %122 {strides = array<i32>} : memref<1x8x8x8xf32, #tpu.memory_space<vmem>>, vector<1x8x8x8xf32>,
    return
  }
  func.func @transform_0(%arg0: i32) -> (i32, i32, i32, i32) {
    %c0_i32 = arith.constant 0 : i32
    %c0_i32_0 = arith.constant 0 : i32
    %c0_i32_1 = arith.constant 0 : i32
    %c0_i32_2 = arith.constant 0 : i32
    return %arg0, %c0_i32, %c0_i32_0, %c0_i32_1 : i32, i32, i32, i32
  }
  func.func @transform_1(%arg0: i32) -> (i32, i32) {
    %c0_i32 = arith.constant 0 : i32
    %c0_i32_0 = arith.constant 0 : i32
    %c0_i32_1 = arith.constant 0 : i32
    return %c0_i32, %c0_i32_0 : i32, i32
  }
  func.func @transform_2(%arg0: i32) -> (i32, i32) {
    %c0_i32 = arith.constant 0 : i32
    %c0_i32_0 = arith.constant 0 : i32
    %c0_i32_1 = arith.constant 0 : i32
    return %c0_i32, %c0_i32_0 : i32, i32
  }
  func.func @transform_3(%arg0: i32) -> (i32, i32, i32, i32) {
    %c0_i32 = arith.constant 0 : i32
    %c0_i32_0 = arith.constant 0 : i32
    %c0_i32_1 = arith.constant 0 : i32
    %c0_i32_2 = arith.constant 0 : i32
    return %arg0, %c0_i32, %c0_i32_0, %c0_i32_1 : i32, i32, i32, i32
  }
}

</mosaic_0001>

<bundles_post_ra>
// kernel: tpu_custom_call.1
= control target key start
LH: loop header
LB: loop body
LE: loop exit
PB: predicated region body
PF: predicated region fallthrough
CT: control target
= control target key end

     0   :  { %8 = vsyncpa [#allocation8], 0  ;;  %s3309_s0 = inlined_call_operand.vmem [shape: f32[2,16,16,4], index: 0, kind: input, shape index: {}]   ;;  %s3310_s1 = inlined_call_operand.vmem [shape: f32[36,8], index: 1, kind: input, shape index: {}]   ;;  %s3311_s2 = inlined_call_operand.vmem [shape: f32[72,8], index: 2, kind: input, shape index: {}]   ;;  %s3312_s3 = inlined_call_operand.hbm [shape: f32[2,8,8,8], index: 3, kind: output, shape index: {}]  }
   0x1   :  { %10 = vsyncpa [#allocation8 + $0x1], 0  ;;  %s2382_s12 = smov 0   ;;  %s2384_s13 = smov 0  }
   0x2   :  { %s2386_s14 = smov 0   ;;  %s2388_s15 = smov 0  }
   0x3 LB: > { %s2403_s16 = sadd.s32 4294967295, %s2345_s15   ;;  %s2119_s17 = sadd.s32 4294967294, %s2345_s15   ;;  %s2345_s15 = sphi %s2388_s15, %s3318_s15   ;;  %s2341_s14 = sphi %s2386_s14, %s3317_s14   ;;  %s2337_s13 = sphi %s2384_s13, %s3316_s13   ;;  %s2333_s12 = sphi %s2382_s12, %s3315_s12  }
   0x4   : > { %s2407_s18 = sadd.s32 1, %s2345_s15   ;;  %s91_s19 = sadd.s32 1, %s2341_s14 }
   0x5   : > { %s88_s20 = ssub.s32 %s2345_s15, %s2407_s18  ;;  %p101_p0 = scmp.ne.s32.totalorder %s2341_s14, %s2337_s13 }
   0x6   : > { %p89_p1 = scmp.eq.s32.totalorder %s88_s20, 0  ;;  %p102_p2 = scmp.eq.s32.totalorder %s2403_s16, 1 }
   0x7   : > { %p107_p3 = scmp.ne.s32.totalorder %s2337_s13, %s2333_s12  ;;  %p108_p4 = scmp.eq.s32.totalorder %s2119_s17, 1 }
   0x8   : > { %s2418_s21 = scalar_select %p89_p1, %s2341_s14, %s91_s19  }
   0x9   : > { %p2420_p5 = por %p102_p2, %p101_p0  ;;  %p2424_p6 = por %p108_p4, %p107_p3 }
   0xa   : > { %p2122_p7 = scmp.ge.s32.totalorder %s2345_s15, 1  ;;  %p140_p8 = scmp.lt.s32.totalorder %s2345_s15, 3 }
   0xc   : > { %p141_p9 = pnand %p2122_p7, %p140_p8 }
   0xd   : > { %p164_p10 = scmp.lt.s32.totalorder (!%p141_p9), %s2403_s16, 1  ;;  %s2348_s29 = smov (!%p141_p9), 4  }
   0xe   : > { %144 = sbr.rel (%p141_p9) target bundleno = 941 (0x3ad), region = 32  ;;  %s2349_s30 = smov (!%p141_p9), 8  }
   0xf   : > { %s2350_s4 = smov (!%p141_p9), 12   ;;  %s2351_s5 = smov (!%p141_p9), 16  }
  0x10   : > { %s2352_s6 = smov (!%p141_p9), 20   ;;  %s2353_s7 = smov (!%p141_p9), 24  }
  0x11   : > { %s2354_s10 = smov (!%p141_p9), 28   ;;  %s2355_s26 = smov (!%p141_p9), 32  }
  0x12   : > { %s2359_s8 = smov (!%p141_p9), 64   ;;  %s2360_s9 = smov (!%p141_p9), [#allocation7]  }
  0x13   : > { %vm367_vm0 = vcmask 31744   ;;  %vm370_vm1 = vcmask 25600   ;;  %v2347_v0 = vmov 0.0   ;;  %s165_s24 = scalar_select %p164_p10, %s2403_s16, 1  ;;  %vm261_vm2 = vcmask 1046528  }
  0x14   : > { %815 = vst.msk [vmem:[#allocation3] sm:$0xff] %vm367_vm0, %v2347_v0  ;;  %368 = vst.msk [vmem:[#allocation2] sm:$0xff] %vm367_vm0, %v2347_v0  ;;  %vm425_vm3 = vcmask 30720   ;;  %vm477_vm4 = vcmask 24576   ;;  %vm1291_vm5 = vcmask 1043456   ;;  %vm900_vm6 = vcmask 64544  }
  0x15   : > { %816 = vst.msk [vmem:[#allocation3 + $0x8] sm:$0x3] %vm370_vm1, %v2347_v0  ;;  %371 = vst.msk [vmem:[#allocation2 + $0x10] sm:$0x3] %vm370_vm1, %v2347_v0  ;;  %s2148_s25 = sshll.u32 %s165_s24, 8  ;;  %vm949_vm7 = vcmask 97344  }
  0x16   : > { %369 = vst.msk [vmem:[#allocation2 + $0x8] sm:$0xff] %vm367_vm0, %v2347_v0  ;;  %372 = vst.msk [vmem:[#allocation2 + $0x18] sm:$0xff] %vm367_vm0, %v2347_v0  ;;  %s2577_s28 = scalar_lea.vmem %s3309_s0, %s2148_s25  ;;  %vm998_vm8 = vcmask 130144   ;;  %vm1047_vm9 = vcmask 162944   ;;  %vm1096_vm10 = vcmask 195744   ;;  %vm1146_vm11 = vcmask 228544  }
  0x17   : > { %373 = vst.msk [vmem:[#allocation2 + $0x20] sm:$0xff] %vm367_vm0, %v2347_v0  ;;  %375 = vst.msk [vmem:[#allocation2 + $0x30] sm:$0xff] %vm367_vm0, %v2347_v0  ;;  %v169_v1 = vld [vmem:[%s2577_s28] sm:$0xff]  ;;  %v170_v2 = vld [vmem:[%s2577_s28 + $0x8] sm:$0xff]  ;;  %vm1195_vm12 = vcmask 261344   ;;  %vm1244_vm13 = vcmask 294144  }
  0x18   : > { %374 = vst.msk [vmem:[#allocation2 + $0x28] sm:$0x3] %vm370_vm1, %v2347_v0  ;;  %377 = vst.msk [vmem:[#allocation2 + $0x40] sm:$0x3] %vm370_vm1, %v2347_v0  ;;  %v171_v3 = vld [vmem:[%s2577_s28 + $0x10] sm:$0xff]  ;;  %v172_v6 = vld [vmem:[%s2577_s28 + $0x18] sm:$0xff] }
  0x19   : > { %376 = vst.msk [vmem:[#allocation2 + $0x38] sm:$0xff] %vm367_vm0, %v2347_v0  ;;  %378 = vst.msk [vmem:[#allocation2 + $0x48] sm:$0xff] %vm367_vm0, %v2347_v0  ;;  %v201_v7 = vmax.f32 %v169_v1, %v171_v3  ;;  %v173_v8 = vld [vmem:[%s2577_s28 + $0x20] sm:$0xff]  ;;  %v174_v9 = vld [vmem:[%s2577_s28 + $0x28] sm:$0xff]  ;;  %v202_v10 = vmax.f32 %v170_v2, %v172_v6  ;;  %vm1266_vm14 = vcmask 293888   ;;  %vm1424_vm15 = vcmask 64512  }
  0x1a   : > { %379 = vst.msk [vmem:[#allocation2 + $0x50] sm:$0xff] %vm367_vm0, %v2347_v0  ;;  %381 = vst.msk [vmem:[#allocation2 + $0x60] sm:$0xff] %vm367_vm0, %v2347_v0  ;;  %v203_v11 = vmax.f32 %v171_v3, %v173_v8  ;;  %v204_v12 = vmax.f32 %v172_v6, %v174_v9  ;;  %v175_v14 = vld [vmem:[%s2577_s28 + $0x30] sm:$0xff]  ;;  %v176_v15 = vld [vmem:[%s2577_s28 + $0x38] sm:$0xff] }
  0x1b   : > { %380 = vst.msk [vmem:[#allocation2 + $0x58] sm:$0x3] %vm370_vm1, %v2347_v0  ;;  %383 = vst.msk [vmem:[#allocation2 + $0x70] sm:$0x3] %vm370_vm1, %v2347_v0  ;;  %v262_v13 = vrot.slane %v201_v7, 1  ;;  %v177_v16 = vld [vmem:[%s2577_s28 + $0x40] sm:$0xff]  ;;  %v205_v19 = vmax.f32 %v173_v8, %v175_v14  ;;  %v206_v20 = vmax.f32 %v174_v9, %v176_v15 }
  0x1c   : > { %382 = vst.msk [vmem:[#allocation2 + $0x68] sm:$0xff] %vm367_vm0, %v2347_v0  ;;  %384 = vst.msk [vmem:[#allocation2 + $0x78] sm:$0xff] %vm367_vm0, %v2347_v0  ;;  %v860_v4 = vld [vmem:[#allocation3 + $0x1] sm:$0xff]  ;;  %v263_v17 = vrot.slane %v202_v10, 1  ;;  %v178_v18 = vld [vmem:[%s2577_s28 + $0x48] sm:$0xff]  ;;  %v207_v21 = vmax.f32 %v175_v14, %v177_v16  ;;  %v265_v23 = vrot.slane %v203_v11, 1 }
  0x1d   : > { %385 = vst.msk [vmem:[#allocation2 + $0x80] sm:$0xff] %vm367_vm0, %v2347_v0  ;;  %387 = vst.msk [vmem:[#allocation2 + $0x90] sm:$0xff] %vm367_vm0, %v2347_v0  ;;  %v909_v5 = vld [vmem:[#allocation3 + $0x2] sm:$0xff]  ;;  %876 = vrot.lane.b32.xlu0 %v860_v4, %s2348_s29  ;;  %v266_v24 = vrot.slane %v204_v12, 1  ;;  %v208_v25 = vmax.f32 %v176_v15, %v178_v18  ;;  %v268_v29 = vrot.slane %v205_v19, 1  ;;  %v269_v30 = vrot.slane %v206_v20, 1 }
  0x1e   : > { %386 = vst.msk [vmem:[#allocation2 + $0x88] sm:$0x3] %vm370_vm1, %v2347_v0  ;;  %389 = vst.msk [vmem:[#allocation2 + $0xa0] sm:$0x3] %vm370_vm1, %v2347_v0  ;;  %925 = vrot.lane.b32.xlu1 %v909_v5, %s2349_s30  ;;  %v179_v22 = vld [vmem:[%s2577_s28 + $0x50] sm:$0xff]  ;;  %v264_v27 = vsel %vm261_vm2, %v262_v13, %v263_v17  ;;  %v338_v28 = vmax.f32 %v202_v10, %v263_v17  ;;  %v180_v31 = vld [vmem:[%s2577_s28 + $0x58] sm:$0xff] }
  0x1f   : > { %388 = vst.msk [vmem:[#allocation2 + $0x98] sm:$0xff] %vm367_vm0, %v2347_v0  ;;  %390 = vst.msk [vmem:[#allocation2 + $0xa8] sm:$0xff] %vm367_vm0, %v2347_v0  ;;  %v2592_v26 = vmax.f32 %v177_v16, %v179_v22  ;;  %v181_v32 = vld [vmem:[%s2577_s28 + $0x60] sm:$0xff]  ;;  %v182_v33 = vld [vmem:[%s2577_s28 + $0x68] sm:$0xff]  ;;  %v267_v34 = vsel %vm261_vm2, %v265_v23, %v266_v24  ;;  %v337_v35 = vmax.f32 %v201_v7, %v264_v27  ;;  %v271_v37 = vrot.slane %v207_v21, 1 }
  0x20   : > { %391 = vst.msk [vmem:[#allocation2 + $0xb0] sm:$0xff] %vm367_vm0, %v2347_v0  ;;  %393 = vst.msk [vmem:[#allocation2 + $0xc0] sm:$0xff] %vm367_vm0, %v2347_v0  ;;  %v340_v36 = vmax.f32 %v204_v12, %v266_v24  ;;  %v183_v38 = vld [vmem:[%s2577_s28 + $0x70] sm:$0xff]  ;;  %v339_v39 = vmax.f32 %v203_v11, %v267_v34  ;;  %v270_v40 = vsel %vm261_vm2, %v268_v29, %v269_v30  ;;  %v272_v41 = vrot.slane %v208_v25, 1  ;;  %v184_v47 = vld [vmem:[%s2577_s28 + $0x78] sm:$0xff] }
  0x21   : > { %392 = vst.msk [vmem:[#allocation2 + $0xb8] sm:$0x3] %vm370_vm1, %v2347_v0  ;;  %395 = vst.msk [vmem:[#allocation2 + $0xd0] sm:$0x3] %vm370_vm1, %v2347_v0  ;;  %v342_v42 = vmax.f32 %v206_v20, %v269_v30  ;;  %v341_v43 = vmax.f32 %v205_v19, %v270_v40  ;;  %v210_v44 = vmax.f32 %v178_v18, %v180_v31  ;;  %v185_v48 = vld [vmem:[%s2577_s28 + $0x80] sm:$0xff]  ;;  %v186_v49 = vld [vmem:[%s2577_s28 + $0x88] sm:$0xff] }
  0x22   : > { %394 = vst.msk [vmem:[#allocation2 + $0xc8] sm:$0xff] %vm367_vm0, %v2347_v0  ;;  %396 = vst.msk [vmem:[#allocation2 + $0xd8] sm:$0xff] %vm367_vm0, %v2347_v0  ;;  %v211_v45 = vmax.f32 %v179_v22, %v181_v32  ;;  %v212_v46 = vmax.f32 %v180_v31, %v182_v33  ;;  %v273_v50 = vsel %vm261_vm2, %v271_v37, %v272_v41  ;;  %v274_v52 = vrot.slane %v2592_v26, 1  ;;  %v187_v62 = vld [vmem:[%s2577_s28 + $0x90] sm:$0xff]  ;;  %v188_v4 = vld [vmem:[%s2577_s28 + $0x98] sm:$0xff] }
  0x23   : > { %397 = vst.msk [vmem:[#allocation2 + $0xe0] sm:$0xff] %vm367_vm0, %v2347_v0  ;;  %399 = vst.msk [vmem:[#allocation2 + $0xf0] sm:$0xff] %vm367_vm0, %v2347_v0  ;;  %v344_v51 = vmax.f32 %v208_v25, %v272_v41  ;;  %v2613_v53 = vmax.f32 %v181_v32, %v183_v38  ;;  %v343_v54 = vmax.f32 %v207_v21, %v273_v50  ;;  %v275_v55 = vrot.slane %v210_v44, 1  ;;  %v189_v5 = vld [vmem:[%s2577_s28 + $0xa0] sm:$0xff]  ;;  %v2629_v10 = vld [vmem:[%s2577_s28 + $0xa8] sm:$0xff] }
  0x24   : > { %398 = vst.msk [vmem:[#allocation2 + $0xe8] sm:$0x3] %vm370_vm1, %v2347_v0  ;;  %401 = vst.msk [vmem:[#allocation2 + $0x100] sm:$0x3] %vm370_vm1, %v2347_v0  ;;  %v277_v56 = vrot.slane %v211_v45, 1  ;;  %v278_v57 = vrot.slane %v212_v46, 1  ;;  %v214_v58 = vmax.f32 %v182_v33, %v184_v47  ;;  %v2617_v59 = vmax.f32 %v183_v38, %v185_v48 }
  0x25   : > { %400 = vst.msk [vmem:[#allocation2 + $0xf8] sm:$0xff] %vm367_vm0, %v2347_v0  ;;  %402 = vst.msk [vmem:[#allocation2 + $0x108] sm:$0xff] %vm367_vm0, %v2347_v0  ;;  %v216_v60 = vmax.f32 %v184_v47, %v186_v49  ;;  %v280_v61 = vrot.slane %v2613_v53, 1  ;;  %v276_v63 = vsel %vm261_vm2, %v274_v52, %v275_v55  ;;  %v346_v2 = vmax.f32 %v210_v44, %v275_v55  ;;  %v2636_v14 = vld [vmem:[%s2577_s28 + $0xb0] sm:$0xff]  ;;  %v2667_v50 = vld [vmem:[%s2577_s28 + $0xb8] sm:$0xff] }
  0x26   : > { %403 = vst.msk [vmem:[#allocation2 + $0x110] sm:$0xff] %vm367_vm0, %v2347_v0  ;;  %405 = vst.msk [vmem:[#allocation2 + $0x120] sm:$0xff] %vm367_vm0, %v2347_v0  ;;  %v279_v1 = vsel %vm261_vm2, %v277_v56, %v278_v57  ;;  %v348_v3 = vmax.f32 %v212_v46, %v278_v57  ;;  %v345_v6 = vmax.f32 %v2592_v26, %v276_v63  ;;  %v281_v8 = vrot.slane %v214_v58, 1 }
  0x27   : > { %404 = vst.msk [vmem:[#allocation2 + $0x118] sm:$0x3] %vm370_vm1, %v2347_v0  ;;  %407 = vst.msk [vmem:[#allocation2 + $0x130] sm:$0x3] %vm370_vm1, %v2347_v0  ;;  %v347_v7 = vmax.f32 %v211_v45, %v279_v1  ;;  %v283_v9 = vrot.slane %v2617_v59, 1  ;;  %v284_v12 = vrot.slane %v216_v60, 1  ;;  %v2633_v13 = vmax.f32 %v185_v48, %v187_v62 }
  0x28   : > { %406 = vst.msk [vmem:[#allocation2 + $0x128] sm:$0xff] %vm367_vm0, %v2347_v0  ;;  %408 = vst.msk [vmem:[#allocation2 + $0x138] sm:$0xff] %vm367_vm0, %v2347_v0  ;;  %v282_v18 = vsel %vm261_vm2, %v280_v61, %v281_v8  ;;  %v350_v19 = vmax.f32 %v214_v58, %v281_v8  ;;  %v218_v20 = vmax.f32 %v186_v49, %v188_v4  ;;  %v193_v58 = vld [vmem:[%s2577_s28 + $0xc0] sm:$0xff] }
  0x29   : > { %409 = vst.msk [vmem:[#allocation2 + $0x140] sm:$0xff] %vm367_vm0, %v2347_v0  ;;  %411 = vst.msk [vmem:[#allocation2 + $0x150] sm:$0xff] %vm367_vm0, %v2347_v0  ;;  %v2642_v21 = vmax.f32 %v187_v62, %v189_v5  ;;  %v285_v25 = vsel %vm261_vm2, %v283_v9, %v284_v12  ;;  %v349_v26 = vmax.f32 %v2613_v53, %v282_v18  ;;  %v286_v33 = vrot.slane %v2633_v13, 1 }
  0x2a   : > { %410 = vst.msk [vmem:[#allocation2 + $0x148] sm:$0x3] %vm370_vm1, %v2347_v0  ;;  %413 = vst.msk [vmem:[#allocation2 + $0x160] sm:$0x3] %vm370_vm1, %v2347_v0  ;;  %v352_v27 = vmax.f32 %v216_v60, %v284_v12  ;;  %v351_v32 = vmax.f32 %v2617_v59, %v285_v25  ;;  %v2656_v34 = vmax.f32 %v189_v5, %v2636_v14  ;;  %v287_v44 = vrot.slane %v218_v20, 1  ;;  %v194_v12 = vld [vmem:[%s2577_s28 + $0xc8] sm:$0xff] }
  0x2b   : > { %412 = vst.msk [vmem:[#allocation2 + $0x158] sm:$0xff] %vm367_vm0, %v2347_v0  ;;  %414 = vst.msk [vmem:[#allocation2 + $0x168] sm:$0xff] %vm367_vm0, %v2347_v0  ;;  %v289_v45 = vrot.slane %v2642_v21, 1 }
  0x2c   : > { %415 = vst.msk [vmem:[#allocation2 + $0x170] sm:$0xff] %vm367_vm0, %v2347_v0  ;;  %417 = vst.msk [vmem:[#allocation2 + $0x180] sm:$0xff] %vm367_vm0, %v2347_v0  ;;  %v354_v56 = vmax.f32 %v218_v20, %v287_v44  ;;  %v2689_v20 = vmax.f32 %v2629_v10, %v2667_v50 }
  0x2d   : > { %416 = vst.msk [vmem:[#allocation2 + $0x178] sm:$0x3] %vm370_vm1, %v2347_v0  ;;  %419 = vst.msk [vmem:[#allocation2 + $0x190] sm:$0x3] %vm370_vm1, %v2347_v0 }
  0x2e   : > { %418 = vst.msk [vmem:[#allocation2 + $0x188] sm:$0xff] %vm367_vm0, %v2347_v0  ;;  %817 = vst.msk [vmem:[#allocation3 + $0x10] sm:$0xff] %vm367_vm0, %v2347_v0 }
  0x2f   : > { %818 = vst.msk [vmem:[#allocation3 + $0x18] sm:$0x3] %vm370_vm1, %v2347_v0  ;;  %820 = vst.msk [vmem:[#allocation3 + $0x28] sm:$0x3] %vm370_vm1, %v2347_v0 }
  0x30   : > { %819 = vst.msk [vmem:[#allocation3 + $0x20] sm:$0xff] %vm367_vm0, %v2347_v0  ;;  %821 = vst.msk [vmem:[#allocation3 + $0x30] sm:$0xff] %vm367_vm0, %v2347_v0 }
  0x31   : > { %822 = vst.msk [vmem:[#allocation3 + $0x38] sm:$0x3] %vm370_vm1, %v2347_v0  ;;  %824 = vst.msk [vmem:[#allocation3 + $0x48] sm:$0x3] %vm370_vm1, %v2347_v0 }
  0x32   : > { %823 = vst.msk [vmem:[#allocation3 + $0x40] sm:$0xff] %vm367_vm0, %v2347_v0  ;;  %825 = vst.msk [vmem:[#allocation3 + $0x50] sm:$0xff] %vm367_vm0, %v2347_v0 }
  0x33   : > { %826 = vst.msk [vmem:[#allocation3 + $0x58] sm:$0x3] %vm370_vm1, %v2347_v0  ;;  %828 = vst.msk [vmem:[#allocation3 + $0x68] sm:$0x3] %vm370_vm1, %v2347_v0 }
  0x34   : > { %827 = vst.msk [vmem:[#allocation3 + $0x60] sm:$0xff] %vm367_vm0, %v2347_v0  ;;  %829 = vst.msk [vmem:[#allocation3 + $0x70] sm:$0xff] %vm367_vm0, %v2347_v0 }
  0x35   : > { %830 = vst.msk [vmem:[#allocation3 + $0x78] sm:$0x3] %vm370_vm1, %v2347_v0  ;;  %832 = vst.msk [vmem:[#allocation3 + $0x88] sm:$0x3] %vm370_vm1, %v2347_v0 }
  0x36   : > { %831 = vst.msk [vmem:[#allocation3 + $0x80] sm:$0xff] %vm367_vm0, %v2347_v0  ;;  %833 = vst.msk [vmem:[#allocation3 + $0x90] sm:$0xff] %vm367_vm0, %v2347_v0 }
  0x37   : > { %834 = vst.msk [vmem:[#allocation3 + $0x98] sm:$0x3] %vm370_vm1, %v2347_v0  ;;  %vm1511_vm1 = vcmask 130112  }
  0x38   : > { %426 = vst.msk [vmem:[#allocation2 + $0x21] sm:$0x7f] %vm425_vm3, %v338_v28  ;;  %428 = vst.msk [vmem:[#allocation2 + $0x39] sm:$0x7f] %vm425_vm3, %v340_v36  ;;  %v220_v28 = vmax.f32 %v188_v4, %v2629_v10 }
  0x39   : > { %424 = vst.msk [vmem:[#allocation2 + $0x19] sm:$0xff] %vm367_vm0, %v337_v35  ;;  %427 = vst.msk [vmem:[#allocation2 + $0x31] sm:$0xff] %vm367_vm0, %v339_v39 }
  0x3a   : > { %456 = vst.msk [vmem:[#allocation2 + $0x9] sm:$0x7f] %vm425_vm3, %v340_v36  ;;  %430 = vst.msk [vmem:[#allocation2 + $0x51] sm:$0x7f] %vm425_vm3, %v342_v42  ;;  %v290_v46 = vrot.slane %v220_v28, 1 }
  0x3b   : > { %455 = vst.msk [vmem:[#allocation2 + $0x1] sm:$0xff] %vm367_vm0, %v339_v39  ;;  %429 = vst.msk [vmem:[#allocation2 + $0x49] sm:$0xff] %vm367_vm0, %v341_v43 }
  0x3c   : > { %432 = vst.msk [vmem:[#allocation2 + $0x69] sm:$0x7f] %vm425_vm3, %v344_v51  ;;  %434 = vst.msk [vmem:[#allocation2 + $0x81] sm:$0x7f] %vm425_vm3, %v346_v2  ;;  %v292_v51 = vrot.slane %v2656_v34, 1  ;;  %v291_v55 = vsel %vm261_vm2, %v289_v45, %v290_v46  ;;  %v356_v57 = vmax.f32 %v220_v28, %v290_v46 }
  0x3d   : > { %431 = vst.msk [vmem:[#allocation2 + $0x61] sm:$0xff] %vm367_vm0, %v343_v54  ;;  %433 = vst.msk [vmem:[#allocation2 + $0x79] sm:$0xff] %vm367_vm0, %v345_v6  ;;  %v288_v54 = vsel %vm261_vm2, %v286_v33, %v287_v44  ;;  %v355_v63 = vmax.f32 %v2642_v21, %v291_v55  ;;  %v2692_v21 = vmax.f32 %v2636_v14, %v193_v58  ;;  %v196_v33 = vld [vmem:[%s2577_s28 + $0xd8] sm:$0xff]  ;;  %v199_v55 = vld [vmem:[%s2577_s28 + $0xf0] sm:$0xff] }
  0x3e   : > { %436 = vst.msk [vmem:[#allocation2 + $0x99] sm:$0x7f] %vm425_vm3, %v348_v3  ;;  %438 = vst.msk [vmem:[#allocation2 + $0xb1] sm:$0x7f] %vm425_vm3, %v350_v19  ;;  %v353_v62 = vmax.f32 %v2633_v13, %v288_v54  ;;  %v2684_v13 = vld [vmem:[%s2577_s28 + $0xd0] sm:$0xff]  ;;  %v2704_v44 = vmax.f32 %v2667_v50, %v194_v12  ;;  %v2711_v54 = vld [vmem:[%s2577_s28 + $0xe8] sm:$0xff] }
  0x3f   : > { %v496_v11 = vld [vmem:[#allocation2 + $0x26] sm:$0x1]  ;;  %v497_v17 = vld [vmem:[#allocation2 + $0x3e] sm:$0x1]  ;;  %435 = vst.msk [vmem:[#allocation2 + $0x91] sm:$0xff] %vm367_vm0, %v347_v7  ;;  %437 = vst.msk [vmem:[#allocation2 + $0xa9] sm:$0xff] %vm367_vm0, %v349_v26  ;;  %v2707_v45 = vmax.f32 %v193_v58, %v2684_v13 }
  0x40   : > { %v461_v15 = vld [vmem:[#allocation2 + $0x1a] sm:$0x1]  ;;  %513 = vst.msk [vmem:[#allocation2 + $0x28] sm:$0x1] %vm477_vm4, %v496_v11  ;;  %v462_v23 = vld [vmem:[#allocation2 + $0x32] sm:$0x1] }
  0x41   : > { %v495_v16 = vld [vmem:[#allocation2 + $0xe] sm:$0x1]  ;;  %479 = vst.msk [vmem:[#allocation2 + $0x18] sm:$0x1] %vm477_vm4, %v461_v15  ;;  %514 = vst.msk [vmem:[#allocation2 + $0x40] sm:$0x1] %vm477_vm4, %v497_v17 }
  0x42   : > { %v460_v22 = vld [vmem:[#allocation2 + $0x2] sm:$0x1]  ;;  %512 = vst.msk [vmem:[#allocation2 + $0x10] sm:$0x1] %vm477_vm4, %v495_v16  ;;  %v597_v24 = vld [vmem:[#allocation2 + $0x1] ss:$2 sm:$0xff] }
  0x43   : > { %478 = vst.msk [vmem:[#allocation2] sm:$0x1] %vm477_vm4, %v460_v22  ;;  %480 = vst.msk [vmem:[#allocation2 + $0x30] sm:$0x1] %vm477_vm4, %v462_v23  ;;  %v599_v29 = vld [vmem:[#allocation2 + $0x19] ss:$2 sm:$0xff] }
  0x44   : > { %v601_v30 = vld [vmem:[#allocation2 + $0x31] ss:$2 sm:$0xff]  ;;  %v630_v31 = vmul.f32 2.0, %v597_v24  ;;  %v631_v35 = vmul.f32 2.0, %v599_v29  ;;  %v463_v37 = vld [vmem:[#allocation2 + $0x4a] sm:$0x1] }
  0x45   : > { %v632_v36 = vmul.f32 2.0, %v601_v30  ;;  %v498_v38 = vld [vmem:[#allocation2 + $0x56] sm:$0x1]  ;;  %440 = vst.msk [vmem:[#allocation2 + $0xc9] sm:$0x7f] %vm425_vm3, %v352_v27 }
  0x46   : > { %v464_v39 = vld [vmem:[#allocation2 + $0x62] sm:$0x1]  ;;  %481 = vst.msk [vmem:[#allocation2 + $0x48] sm:$0x1] %vm477_vm4, %v463_v37  ;;  %v499_v40 = vld [vmem:[#allocation2 + $0x6e] sm:$0x1] }
  0x47   : > { %515 = vst.msk [vmem:[#allocation2 + $0x58] sm:$0x1] %vm477_vm4, %v498_v38  ;;  %v603_v41 = vld [vmem:[#allocation2 + $0x49] ss:$2 sm:$0xff]  ;;  %482 = vst.msk [vmem:[#allocation2 + $0x60] sm:$0x1] %vm477_vm4, %v464_v39 }
  0x48   : > { %439 = vst.msk [vmem:[#allocation2 + $0xc1] sm:$0xff] %vm367_vm0, %v351_v32  ;;  %v605_v42 = vld [vmem:[#allocation2 + $0x61] ss:$2 sm:$0xff]  ;;  %v633_v43 = vmul.f32 2.0, %v603_v41  ;;  %v500_v48 = vld [vmem:[#allocation2 + $0x86] sm:$0x1] }
  0x49   : > { %516 = vst.msk [vmem:[#allocation2 + $0x70] sm:$0x1] %vm477_vm4, %v499_v40  ;;  %v634_v47 = vmul.f32 2.0, %v605_v42  ;;  %v501_v49 = vld [vmem:[#allocation2 + $0x9e] sm:$0x1]  ;;  %v844_v15 = vld [vmem:[#allocation3] sm:$0xff] }
  0x4a   : > { %v535_v52 = vld [vmem:[#allocation2 + $0x28] ss:$2 sm:$0x1]  ;;  %v465_v53 = vld [vmem:[#allocation2 + $0x7a] sm:$0x1]  ;;  %441 = vst.msk [vmem:[#allocation2 + $0xd9] sm:$0xff] %vm367_vm0, %v353_v62 }
  0x4b   : > { %517 = vst.msk [vmem:[#allocation2 + $0x88] sm:$0x1] %vm477_vm4, %v500_v48  ;;  %518 = vst.msk [vmem:[#allocation2 + $0xa0] sm:$0x1] %vm477_vm4, %v501_v49  ;;  %v533_v60 = vld [vmem:[#allocation2 + $0x18] ss:$2 sm:$0xff] }
  0x4c   : > { %v531_v59 = vld [vmem:[#allocation2 + $0x10] ss:$2 sm:$0x1]  ;;  %v702_v61 = vrot.slane %v535_v52, 1  ;;  %483 = vst.msk [vmem:[#allocation2 + $0x78] sm:$0x1] %vm477_vm4, %v465_v53  ;;  %v648_v3 = vadd.f32 %v631_v35, %v533_v60 }
  0x4d   : > { %v529_v1 = vld [vmem:[#allocation2] ss:$2 sm:$0xff]  ;;  %v537_v2 = vld [vmem:[#allocation2 + $0x30] ss:$2 sm:$0xff]  ;;  %v699_v4 = vrot.slane %v531_v59, 1  ;;  %v701_v5 = vrot.slane %v533_v60, 1 }
  0x4e   : > { %442 = vst.msk [vmem:[#allocation2 + $0xe1] sm:$0x7f] %vm425_vm3, %v354_v56  ;;  %444 = vst.msk [vmem:[#allocation2 + $0xf9] sm:$0x7f] %vm425_vm3, %v356_v57  ;;  %v647_v7 = vadd.f32 %v630_v31, %v529_v1  ;;  %v649_v8 = vadd.f32 %v632_v36, %v537_v2  ;;  %v698_v9 = vrot.slane %v529_v1, 1  ;;  %v704_v11 = vrot.slane %v537_v2, 1 }
  0x4f   : > { %v539_v6 = vld [vmem:[#allocation2 + $0x40] ss:$2 sm:$0x1]  ;;  %443 = vst.msk [vmem:[#allocation2 + $0xf1] sm:$0xff] %vm367_vm0, %v355_v63  ;;  %v703_v16 = vsel %vm261_vm2, %v701_v5, %v702_v61  ;;  %v541_v18 = vld [vmem:[#allocation2 + $0x48] ss:$2 sm:$0xff]  ;;  %v2715_v61 = vmax.f32 %v194_v12, %v196_v33 }
  0x50   : > { %v705_v17 = vrot.slane %v539_v6, 1  ;;  %v543_v19 = vld [vmem:[#allocation2 + $0x58] ss:$2 sm:$0x1]  ;;  %852 = vst.msk [vmem:[#allocation5] sm:$0xff] %vm367_vm0, %v844_v15  ;;  %v700_v22 = vsel %vm261_vm2, %v698_v9, %v699_v4  ;;  %v767_v23 = vadd.f32 %v703_v16, %v648_v3  ;;  %v650_v26 = vadd.f32 %v633_v43, %v541_v18  ;;  %v197_v39 = vld [vmem:[%s2577_s28 + $0xe0] sm:$0xff] }
  0x51   : > { %v545_v24 = vld [vmem:[#allocation2 + $0x60] ss:$2 sm:$0xff]  ;;  %v547_v25 = vld [vmem:[#allocation2 + $0x70] ss:$2 sm:$0x1]  ;;  %v707_v27 = vrot.slane %v541_v18, 1  ;;  %v766_v29 = vadd.f32 %v700_v22, %v647_v7  ;;  %v2724_v9 = vmax.f32 %v2684_v13, %v197_v39 }
  0x52   : > { %v706_v28 = vsel %vm261_vm2, %v704_v11, %v705_v17  ;;  %v651_v30 = vadd.f32 %v634_v47, %v545_v24  ;;  %v708_v31 = vrot.slane %v543_v19, 1  ;;  %v466_v10 = vld [vmem:[#allocation2 + $0x92] sm:$0x1]  ;;  %v607_v32 = vld [vmem:[#allocation2 + $0x79] ss:$2 sm:$0xff]  ;;  %v783_v35 = vmul.f32 2.0, %v767_v23 }
  0x53   : > { %v768_v14 = vadd.f32 %v706_v28, %v649_v8  ;;  %v710_v36 = vrot.slane %v545_v24, 1  ;;  %v711_v37 = vrot.slane %v547_v25, 1  ;;  %484 = vst.msk [vmem:[#allocation2 + $0x90] sm:$0x1] %vm477_vm4, %v466_v10  ;;  %v549_v41 = vld [vmem:[#allocation2 + $0x78] ss:$2 sm:$0xff]  ;;  %v2734_v25 = vmax.f32 %v196_v33, %v2711_v54 }
  0x54   : > { %v551_v38 = vld [vmem:[#allocation2 + $0x88] ss:$2 sm:$0x1]  ;;  %v709_v40 = vsel %vm261_vm2, %v707_v27, %v708_v31  ;;  %v2701_v42 = vld [vmem:[#allocation2 + $0xa0] ss:$2 sm:$0x1]  ;;  %v791_v46 = vadd.f32 %v783_v35, %v766_v29 }
  0x55   : > { %v635_v43 = vmul.f32 2.0, %v607_v32  ;;  %v712_v47 = vsel %vm261_vm2, %v710_v36, %v711_v37  ;;  %v769_v48 = vadd.f32 %v709_v40, %v650_v26  ;;  %v609_v49 = vld [vmem:[#allocation2 + $0x91] ss:$2 sm:$0xff]  ;;  %v713_v52 = vrot.slane %v549_v41, 1  ;;  %v467_v53 = vld [vmem:[#allocation2 + $0xaa] sm:$0x1] }
  0x56   : > { %v636_v56 = vmul.f32 2.0, %v609_v49  ;;  %v714_v59 = vrot.slane %v551_v38, 1  ;;  %v468_v60 = vld [vmem:[#allocation2 + $0xc2] sm:$0x1]  ;;  %485 = vst.msk [vmem:[#allocation2 + $0xa8] sm:$0x1] %vm477_vm4, %v467_v53  ;;  %v799_v58 = vadd.f32 %v791_v46, %v768_v14  ;;  %v770_v62 = vadd.f32 %v712_v47, %v651_v30 }
  0x57   : > { %v652_v57 = vadd.f32 %v635_v43, %v549_v41  ;;  %v502_v50 = vld [vmem:[#allocation2 + $0xb6] sm:$0x1]  ;;  %v784_v63 = vmul.f32 2.0, %v769_v48  ;;  %v717_v1 = vrot.slane %v2701_v42, 1  ;;  %486 = vst.msk [vmem:[#allocation2 + $0xc0] sm:$0x1] %vm477_vm4, %v468_v60  ;;  %v2736_v26 = vmax.f32 %v197_v39, %v199_v55 }
  0x58   : > { %v503_v2 = vld [vmem:[#allocation2 + $0xce] sm:$0x1]  ;;  %519 = vst.msk [vmem:[#allocation2 + $0xb8] sm:$0x1] %vm477_vm4, %v502_v50  ;;  %v611_v3 = vld [vmem:[#allocation2 + $0xa9] ss:$2 sm:$0xff]  ;;  %v715_v4 = vsel %vm261_vm2, %v713_v52, %v714_v59 }
  0x59   : > { %520 = vst.msk [vmem:[#allocation2 + $0xd0] sm:$0x1] %vm477_vm4, %v503_v2  ;;  %v613_v5 = vld [vmem:[#allocation2 + $0xc1] ss:$2 sm:$0xff]  ;;  %v637_v6 = vmul.f32 2.0, %v611_v3  ;;  %v293_v8 = vrot.slane %v2689_v20, 1  ;;  %v792_v12 = vadd.f32 %v784_v63, %v768_v14  ;;  %v771_v15 = vadd.f32 %v715_v4, %v652_v57 }
  0x5a   : > { %v469_v7 = vld [vmem:[#allocation2 + $0xda] sm:$0x1]  ;;  %v807_v11 = vmul.f32 0.0625, %v799_v58  ;;  %v638_v16 = vmul.f32 2.0, %v613_v5  ;;  %v470_v17 = vld [vmem:[#allocation2 + $0xf2] sm:$0x1] }
  0x5b   : > { %487 = vst.msk [vmem:[#allocation2 + $0xd8] sm:$0x1] %vm477_vm4, %v469_v7  ;;  %v504_v18 = vld [vmem:[#allocation2 + $0xe6] sm:$0x1]  ;;  %v553_v19 = vld [vmem:[#allocation2 + $0x90] ss:$2 sm:$0xff]  ;;  %v294_v13 = vsel %vm261_vm2, %v292_v51, %v293_v8  ;;  %v358_v24 = vmax.f32 %v2689_v20, %v293_v8  ;;  %v800_v27 = vadd.f32 %v792_v12, %v770_v62 }
  0x5c   : > { %488 = vst.msk [vmem:[#allocation2 + $0xf0] sm:$0x1] %vm477_vm4, %v470_v17  ;;  %v505_v22 = vld [vmem:[#allocation2 + $0xfe] sm:$0x1]  ;;  %521 = vst.msk [vmem:[#allocation2 + $0xe8] sm:$0x1] %vm477_vm4, %v504_v18  ;;  %v653_v28 = vadd.f32 %v636_v56, %v553_v19  ;;  %v357_v37 = vmax.f32 %v2656_v34, %v294_v13 }
  0x5d   : > { %v615_v23 = vld [vmem:[#allocation2 + $0xd9] ss:$2 sm:$0xff]  ;;  %836 = vst.msk [vmem:[#allocation3 + $0x11] sm:$0xff] %vm367_vm0, %v807_v11  ;;  %v716_v29 = vrot.slane %v553_v19, 1  ;;  %v785_v30 = vmul.f32 2.0, %v771_v15  ;;  %v295_v51 = vrot.slane %v2692_v21, 1 }
  0x5e   : > { %522 = vst.msk [vmem:[#allocation2 + $0x100] sm:$0x1] %vm477_vm4, %v505_v22  ;;  %v617_v31 = vld [vmem:[#allocation2 + $0xf1] ss:$2 sm:$0xff]  ;;  %v639_v10 = vmul.f32 2.0, %v615_v23  ;;  %v296_v20 = vrot.slane %v2704_v44, 1 }
  0x5f   : > { %v640_v32 = vmul.f32 2.0, %v617_v31  ;;  %446 = vst.msk [vmem:[#allocation2 + $0x111] sm:$0x7f] %vm425_vm3, %v358_v24  ;;  %v808_v33 = vmul.f32 0.0625, %v800_v27  ;;  %v718_v14 = vsel %vm261_vm2, %v716_v29, %v717_v1  ;;  %v793_v35 = vadd.f32 %v785_v30, %v770_v62  ;;  %v557_v36 = vld [vmem:[#allocation2 + $0xa8] ss:$2 sm:$0xff] }
  0x60   : > { %v200_v38 = vld [vmem:[%s2577_s28 + $0xf8] sm:$0xff]  ;;  %v772_v39 = vadd.f32 %v718_v14, %v653_v28  ;;  %v561_v41 = vld [vmem:[#allocation2 + $0xc0] ss:$2 sm:$0xff]  ;;  %v654_v42 = vadd.f32 %v637_v6, %v557_v36  ;;  %v719_v43 = vrot.slane %v557_v36, 1  ;;  %v297_v46 = vsel %vm261_vm2, %v295_v51, %v296_v20  ;;  %445 = vst.msk [vmem:[#allocation2 + $0x109] sm:$0xff] %vm367_vm0, %v357_v37 }
  0x61   : > { %v559_v40 = vld [vmem:[#allocation2 + $0xb8] ss:$2 sm:$0x1]  ;;  %837 = vst.msk [vmem:[#allocation3 + $0x21] sm:$0xff] %vm367_vm0, %v808_v33  ;;  %v655_v48 = vadd.f32 %v638_v16, %v561_v41  ;;  %v722_v52 = vrot.slane %v561_v41, 1  ;;  %v359_v53 = vmax.f32 %v2692_v21, %v297_v46  ;;  %v360_v57 = vmax.f32 %v2704_v44, %v296_v20 }
  0x62   : > { %v563_v47 = vld [vmem:[#allocation2 + $0xd0] ss:$2 sm:$0x1]  ;;  %v720_v49 = vrot.slane %v559_v40, 1  ;;  %v801_v55 = vadd.f32 %v793_v35, %v772_v39  ;;  %v565_v56 = vld [vmem:[#allocation2 + $0xd8] ss:$2 sm:$0xff]  ;;  %v230_v1 = vmax.f32 %v2711_v54, %v200_v38 }
  0x63   : > { %v723_v34 = vrot.slane %v563_v47, 1  ;;  %v298_v59 = vrot.slane %v2707_v45, 1  ;;  %v567_v50 = vld [vmem:[#allocation2 + $0xe8] ss:$2 sm:$0x1]  ;;  %v656_v62 = vadd.f32 %v639_v10, %v565_v56  ;;  %v725_v63 = vrot.slane %v565_v56, 1 }
  0x64   : > { %v721_v60 = vsel %vm261_vm2, %v719_v43, %v720_v49  ;;  %v569_v58 = vld [vmem:[#allocation2 + $0xf0] ss:$2 sm:$0xff]  ;;  %447 = vst.msk [vmem:[#allocation2 + $0x121] sm:$0xff] %vm367_vm0, %v359_v53  ;;  %v2755_v21 = vld [vmem:[#allocation3 + $0x12] sm:$0xff]  ;;  %v809_v4 = vmul.f32 0.0625, %v801_v55  ;;  %v726_v8 = vrot.slane %v567_v50, 1 }
  0x65   : > { %v2757_v2 = vld [vmem:[#allocation3 + $0x11] sm:$0xff]  ;;  %v724_v44 = vsel %vm261_vm2, %v722_v52, %v723_v34  ;;  %v773_v5 = vadd.f32 %v721_v60, %v654_v42  ;;  %v657_v6 = vadd.f32 %v640_v32, %v569_v58  ;;  %448 = vst.msk [vmem:[#allocation2 + $0x129] sm:$0x7f] %vm425_vm3, %v360_v57  ;;  %927 = vrot.lane.b32.xlu1 %v2755_v21, %s2349_s30  ;;  %v571_v54 = vld [vmem:[#allocation2 + $0x100] ss:$2 sm:$0x1] }
  0x66   : > { %v958_v3 = vld [vmem:[#allocation3 + $0x10] sm:$0xff]  ;;  %878 = vrot.lane.b32.xlu0 %v2757_v2, %s2348_s29  ;;  %v774_v7 = vadd.f32 %v724_v44, %v655_v48  ;;  %v728_v11 = vrot.slane %v569_v58, 1  ;;  %v299_v12 = vrot.slane %v2715_v61, 1  ;;  %838 = vst.msk [vmem:[#allocation3 + $0x31] sm:$0xff] %vm367_vm0, %v809_v4  ;;  %v729_v16 = vrot.slane %v571_v54, 1 }
  0x67   : > { %853 = vst.msk [vmem:[#allocation5 + $0x8] sm:$0xff] %vm367_vm0, %v958_v3  ;;  %v786_v15 = vmul.f32 2.0, %v773_v5  ;;  %v506_v17 = vld [vmem:[#allocation2 + $0x116] sm:$0x1]  ;;  %v301_v18 = vrot.slane %v2724_v9, 1  ;;  %v302_v19 = vrot.slane %v2734_v25, 1  ;;  %v727_v22 = vsel %vm261_vm2, %v725_v63, %v726_v8 }
  0x68   : > { %523 = vst.msk [vmem:[#allocation2 + $0x118] sm:$0x1] %vm477_vm4, %v506_v17  ;;  %v300_v23 = vsel %vm261_vm2, %v298_v59, %v299_v12  ;;  %v304_v13 = vrot.slane %v2736_v26, 1  ;;  %v362_v24 = vmax.f32 %v2715_v61, %v299_v12  ;;  %v2775_v27 = vld [vmem:[#allocation3 + $0x20] sm:$0xff]  ;;  %v730_v29 = vsel %vm261_vm2, %v728_v11, %v729_v16  ;;  %v471_v10 = vld [vmem:[#allocation2 + $0x10a] sm:$0x1] }
  0x69   : > { %v794_v28 = vadd.f32 %v786_v15, %v772_v39  ;;  %v775_v30 = vadd.f32 %v727_v22, %v656_v62  ;;  %v303_v31 = vsel %vm261_vm2, %v301_v18, %v302_v19  ;;  %976 = vrot.lane.b32.xlu1 %v2775_v27, %s2350_s4  ;;  %v361_v32 = vmax.f32 %v2707_v45, %v300_v23  ;;  %v2787_v20 = vld [vmem:[#allocation3 + $0x21] sm:$0xff] }
  0x6a   : > { %974 = vrot.lane.b32.xlu0 %v958_v3, %s2350_s4  ;;  %v363_v51 = vmax.f32 %v2724_v9, %v303_v31  ;;  %450 = vst.msk [vmem:[#allocation2 + $0x141] sm:$0x7f] %vm425_vm3, %v362_v24  ;;  %v305_v61 = vrot.slane %v230_v1, 1  ;;  %v2789_v14 = vadd.f32 %v730_v29, %v657_v6  ;;  %v364_v37 = vmax.f32 %v2734_v25, %v302_v19  ;;  %v619_v9 = vld [vmem:[#allocation2 + $0x109] ss:$2 sm:$0xff] }
  0x6b   : > { %854 = vst.msk [vmem:[#allocation5 + $0x10] sm:$0xff] %vm367_vm0, %v2775_v27  ;;  %v802_v33 = vadd.f32 %v794_v28, %v774_v7  ;;  %v787_v35 = vmul.f32 2.0, %v775_v30  ;;  %v472_v36 = vld [vmem:[#allocation2 + $0x122] sm:$0x1]  ;;  %449 = vst.msk [vmem:[#allocation2 + $0x139] sm:$0xff] %vm367_vm0, %v361_v32  ;;  %v641_v48 = vmul.f32 2.0, %v619_v9 }
  0x6c   : > { %489 = vst.msk [vmem:[#allocation2 + $0x108] sm:$0x1] %vm477_vm4, %v471_v10  ;;  %490 = vst.msk [vmem:[#allocation2 + $0x120] sm:$0x1] %vm477_vm4, %v472_v36  ;;  %v507_v45 = vld [vmem:[#allocation2 + $0x12e] sm:$0x1]  ;;  %v306_v38 = vsel %vm261_vm2, %v304_v13, %v305_v61  ;;  %v366_v39 = vmax.f32 %v230_v1, %v305_v61 }
  0x6d   : > { %451 = vst.msk [vmem:[#allocation2 + $0x151] sm:$0xff] %vm367_vm0, %v363_v51  ;;  %458 = vst.msk [vmem:[#allocation2 + $0x181] sm:$0xff] %vm367_vm0, %v363_v51  ;;  %v810_v40 = vmul.f32 0.0625, %v802_v33  ;;  %v795_v41 = vadd.f32 %v787_v35, %v774_v7  ;;  %v621_v42 = vld [vmem:[#allocation2 + $0x121] ss:$2 sm:$0xff]  ;;  %v365_v25 = vmax.f32 %v2736_v26, %v306_v38  ;;  %880 = vrot.lane.b32.xlu1 %v2787_v20, %s2348_s29  ;;  %v2818_v55 = vld [vmem:[#allocation3 + $0x22] sm:$0xff] }
  0x6e   : > { %524 = vst.msk [vmem:[#allocation2 + $0x130] sm:$0x1] %vm477_vm4, %v507_v45  ;;  %1023 = vrot.lane.b32.xlu0 %v2757_v2, %s2351_s5  ;;  %v2806_v43 = vld [vmem:[#allocation3 + $0x30] sm:$0xff]  ;;  %v642_v26 = vmul.f32 2.0, %v621_v42 }
  0x6f   : > { %452 = vst.msk [vmem:[#allocation2 + $0x159] sm:$0x7f] %vm425_vm3, %v364_v37  ;;  %459 = vst.msk [vmem:[#allocation2 + $0x189] sm:$0x7f] %vm425_vm3, %v364_v37  ;;  %v803_v46 = vadd.f32 %v795_v41, %v2789_v14  ;;  %v2821_v56 = vld [vmem:[#allocation3 + $0x31] sm:$0xff] }
  0x70   : > { %454 = vst.msk [vmem:[#allocation2 + $0x171] sm:$0x7f] %vm425_vm3, %v366_v39  ;;  %v575_v47 = vld [vmem:[#allocation2 + $0x118] ss:$2 sm:$0x1]  ;;  %v2848_v28 = vld [vmem:[#allocation3 + $0x32] sm:$0xff] }
  0x71   : > { %839 = vst.msk [vmem:[#allocation3 + $0x41] sm:$0xff] %vm367_vm0, %v810_v40  ;;  %453 = vst.msk [vmem:[#allocation2 + $0x169] sm:$0xff] %vm367_vm0, %v365_v25  ;;  %v811_v49 = vmul.f32 0.0625, %v803_v46  ;;  %v732_v52 = vrot.slane %v575_v47, 1  ;;  %v508_v53 = vld [vmem:[#allocation2 + $0x146] sm:$0x1]  ;;  %1072 = vrot.lane.b32.xlu1 %v2755_v21, %s2352_s6 }
  0x72   : > { %855 = vst.msk [vmem:[#allocation5 + $0x18] sm:$0xff] %vm367_vm0, %v2806_v43  ;;  %1025 = vrot.lane.b32.xlu0 %v2787_v20, %s2351_s5  ;;  %v473_v50 = vld [vmem:[#allocation2 + $0x13a] sm:$0x1]  ;;  %v623_v4 = vld [vmem:[#allocation2 + $0x139] ss:$2 sm:$0xff] }
  0x73   : > { %v573_v34 = vld [vmem:[#allocation2 + $0x108] ss:$2 sm:$0xff]  ;;  %525 = vst.msk [vmem:[#allocation2 + $0x148] sm:$0x1] %vm477_vm4, %v508_v53  ;;  %491 = vst.msk [vmem:[#allocation2 + $0x138] sm:$0x1] %vm477_vm4, %v473_v50 }
  0x74   : > { %840 = vst.msk [vmem:[#allocation3 + $0x51] sm:$0xff] %vm367_vm0, %v811_v49  ;;  %v577_v57 = vld [vmem:[#allocation2 + $0x120] ss:$2 sm:$0xff]  ;;  %v658_v59 = vadd.f32 %v641_v48, %v573_v34  ;;  %v731_v60 = vrot.slane %v573_v34, 1  ;;  %v474_v1 = vld [vmem:[#allocation2 + $0x152] sm:$0x1] }
  0x75   : > { %v579_v58 = vld [vmem:[#allocation2 + $0x130] ss:$2 sm:$0x1]  ;;  %v659_v62 = vadd.f32 %v642_v26, %v577_v57  ;;  %v734_v63 = vrot.slane %v577_v57, 1  ;;  %492 = vst.msk [vmem:[#allocation2 + $0x150] sm:$0x1] %vm477_vm4, %v474_v1  ;;  %929 = vrot.lane.b32.xlu1 %v2818_v55, %s2349_s30 }
  0x76   : > { %v733_v21 = vsel %vm261_vm2, %v731_v60, %v732_v52  ;;  %v735_v2 = vrot.slane %v579_v58, 1  ;;  %v509_v3 = vld [vmem:[#allocation2 + $0x15e] sm:$0x1]  ;;  %882 = vrot.lane.b32.xlu0 %v2821_v56, %s2348_s29  ;;  %v625_v7 = vld [vmem:[#allocation2 + $0x151] ss:$2 sm:$0xff]  ;;  %v643_v15 = vmul.f32 2.0, %v623_v4 }
  0x77   : > { %v777_v5 = vadd.f32 %v733_v21, %v658_v59  ;;  %526 = vst.msk [vmem:[#allocation2 + $0x160] sm:$0x1] %vm477_vm4, %v509_v3  ;;  %v476_v8 = vld [vmem:[#allocation2 + $0x182] sm:$0x1]  ;;  %v510_v16 = vld [vmem:[#allocation2 + $0x176] sm:$0x1] }
  0x78   : > { %v2831_v44 = vld [vmem:[#allocation3 + $0x40] sm:$0xff]  ;;  %v736_v6 = vsel %vm261_vm2, %v734_v63, %v735_v2  ;;  %v475_v54 = vld [vmem:[#allocation2 + $0x16a] sm:$0x1]  ;;  %494 = vst.msk [vmem:[#allocation2 + $0x180] sm:$0x1] %vm477_vm4, %v476_v8  ;;  %v644_v19 = vmul.f32 2.0, %v625_v7 }
  0x79   : > { %856 = vst.msk [vmem:[#allocation5 + $0x20] sm:$0xff] %vm367_vm0, %v2831_v44  ;;  %v778_v11 = vadd.f32 %v736_v6, %v659_v62  ;;  %v788_v12 = vmul.f32 2.0, %v777_v5  ;;  %v511_v17 = vld [vmem:[#allocation2 + $0x18e] sm:$0x1]  ;;  %v627_v22 = vld [vmem:[#allocation2 + $0x169] ss:$2 sm:$0xff]  ;;  %1122 = vrot.lane.b32.xlu1 %v2775_v27, %s2353_s7 }
  0x7a   : > { %493 = vst.msk [vmem:[#allocation2 + $0x168] sm:$0x1] %vm477_vm4, %v475_v54  ;;  %v583_v18 = vld [vmem:[#allocation2 + $0x148] ss:$2 sm:$0x1]  ;;  %1074 = vrot.lane.b32.xlu0 %v2818_v55, %s2352_s6  ;;  %v645_v27 = vmul.f32 2.0, %v627_v22 }
  0x7b   : > { %527 = vst.msk [vmem:[#allocation2 + $0x178] sm:$0x1] %vm477_vm4, %v510_v16  ;;  %528 = vst.msk [vmem:[#allocation2 + $0x190] sm:$0x1] %vm477_vm4, %v511_v17  ;;  %v2845_v23 = vld [vmem:[#allocation3 + $0x50] sm:$0xff]  ;;  %v796_v13 = vadd.f32 %v788_v12, %v2789_v14  ;;  %v738_v24 = vrot.slane %v583_v18, 1 }
  0x7c   : > { %v581_v29 = vld [vmem:[#allocation2 + $0x138] ss:$2 sm:$0xff]  ;;  %v629_v30 = vld [vmem:[#allocation2 + $0x181] ss:$2 sm:$0xff]  ;;  %857 = vst.msk [vmem:[#allocation5 + $0x28] sm:$0xff] %vm367_vm0, %v2845_v23 }
  0x7d   : > { %v804_v31 = vadd.f32 %v796_v13, %v778_v11  ;;  %v585_v10 = vld [vmem:[#allocation2 + $0x150] ss:$2 sm:$0xff]  ;;  %v660_v32 = vadd.f32 %v643_v15, %v581_v29  ;;  %v737_v51 = vrot.slane %v581_v29, 1  ;;  %978 = vrot.lane.b32.xlu1 %v2806_v43, %s2350_s4  ;;  %v646_v45 = vmul.f32 2.0, %v629_v30  ;;  %v1265_v49 = vld [vmem:[%s3310_s1 + $0x20] sm:$0xf] }
  0x7e   : > { %v587_v61 = vld [vmem:[#allocation2 + $0x160] ss:$2 sm:$0x1]  ;;  %v661_v33 = vadd.f32 %v644_v19, %v585_v10  ;;  %v740_v35 = vrot.slane %v585_v10, 1  ;;  %931 = vrot.lane.b32.xlu0 %v2848_v28, %s2349_s30  ;;  %2180 = vmatprep.subr.msk.mxu0 %vm1291_vm5, %v1265_v49  ;;  %v1264_v58 = vld [vmem:[%s3310_s1 + $0x18] sm:$0xff]  ;;  %v1262_v3 = vld [vmem:[%s3310_s1 + $0x8] sm:$0xff] }
  0x7f   : > { %v812_v14 = vmul.f32 0.0625, %v804_v31  ;;  %v739_v36 = vsel %vm261_vm2, %v737_v51, %v738_v24  ;;  %v741_v37 = vrot.slane %v587_v61, 1  ;;  %v593_v39 = vld [vmem:[#allocation2 + $0x180] ss:$2 sm:$0xff]  ;;  %2181 = vmatpush3.msk.msra.mxu0 %vm1291_vm5, %v1265_v49  ;;  %v1010_v6 = vld [vmem:[#allocation3 + $0x41] sm:$0xff]  ;;  %1430 = vst.msk [vmem:[#allocation4 + $0x20] sm:$0xff] %vm1424_vm15, %v2347_v0 }
  0x80   : > { %v779_v9 = vadd.f32 %v739_v36, %v660_v32  ;;  %v663_v52 = vadd.f32 %v646_v45, %v593_v39  ;;  %v746_v53 = vrot.slane %v593_v39, 1  ;;  %2182 = vmatprep.subr.mxu0 %v1264_v58  ;;  %v1261_v5 = vld [vmem:[%s3310_s1] sm:$0xff]  ;;  %1425 = vst.msk [vmem:[#allocation4] sm:$0xff] %vm1424_vm15, %v2347_v0  ;;  %1428 = vst.msk [vmem:[#allocation4 + $0x10] sm:$0xff] %vm1424_vm15, %v2347_v0 }
  0x81   : > { %v589_v38 = vld [vmem:[#allocation2 + $0x168] ss:$2 sm:$0xff]  ;;  %841 = vst.msk [vmem:[#allocation3 + $0x61] sm:$0xff] %vm367_vm0, %v812_v14  ;;  %v742_v40 = vsel %vm261_vm2, %v740_v35, %v741_v37  ;;  %1171 = vrot.lane.b32.xlu1 %v2787_v20, %s2354_s10  ;;  %2183 = vmatpush3.msra.mxu0 %v1264_v58 }
  0x82   : > { %v591_v41 = vld [vmem:[#allocation2 + $0x178] ss:$2 sm:$0x1]  ;;  %v595_v42 = vld [vmem:[#allocation2 + $0x190] ss:$2 sm:$0x1]  ;;  %v662_v25 = vadd.f32 %v645_v27, %v589_v38  ;;  %v780_v46 = vadd.f32 %v742_v40, %v661_v33  ;;  %1124 = vrot.lane.b32.xlu0 %v2806_v43, %s2353_s7 }
  0x83   : > { %v789_v47 = vmul.f32 2.0, %v779_v9  ;;  %v743_v48 = vrot.slane %v589_v38, 1  ;;  %v744_v26 = vrot.slane %v591_v41, 1  ;;  %v747_v34 = vrot.slane %v595_v42, 1  ;;  %v1263_v43 = vld [vmem:[%s3310_s1 + $0x10] sm:$0xff]  ;;  %v865_v54 = vld [vmem:[#allocation3 + $0x51] sm:$0xff] }
  0x84   : > { %2184 = vmatprep.subr.mxu0 %v1263_v43  ;;  %v914_v8 = vld [vmem:[#allocation3 + $0x52] sm:$0xff]  ;;  %1432 = vst.msk [vmem:[#allocation4 + $0x30] sm:$0xff] %vm1424_vm15, %v2347_v0  ;;  %1434 = vst.msk [vmem:[#allocation4 + $0x40] sm:$0xff] %vm1424_vm15, %v2347_v0 }
  0x85   : > { %v797_v57 = vadd.f32 %v789_v47, %v778_v11  ;;  %v745_v59 = vsel %vm261_vm2, %v743_v48, %v744_v26  ;;  %v748_v60 = vsel %vm261_vm2, %v746_v53, %v747_v34  ;;  %1027 = vrot.lane.b32.xlu1 %v2821_v56, %s2351_s5  ;;  %2185 = vmatpush3.msra.mxu0 %v1263_v43  ;;  %v1162_v13 = vld [vmem:[#allocation3 + $0x91] sm:$0xff]  ;;  %vm1560_vm2 = vcmask 195712  }
  0x86   : > { %v781_v50 = vadd.f32 %v745_v59, %v662_v25  ;;  %980 = vrot.lane.b32.xlu0 %v2831_v44, %s2350_s4  ;;  %v782_v62 = vadd.f32 %v748_v60, %v663_v52  ;;  %2186 = vmatprep.subr.mxu0 %v1262_v3  ;;  %v1211_v29 = vld [vmem:[#allocation3 + $0x92] sm:$0xff]  ;;  %1436 = vst.msk [vmem:[#allocation4 + $0x50] sm:$0xff] %vm1424_vm15, %v2347_v0  ;;  %1438 = vst.msk [vmem:[#allocation4 + $0x60] sm:$0xff] %vm1424_vm15, %v2347_v0 }
  0x87   : > { %v805_v20 = vadd.f32 %v797_v57, %v780_v46  ;;  %2187 = vmatpush3.msra.mxu0 %v1262_v3  ;;  %1440 = vst.msk [vmem:[#allocation4 + $0x70] sm:$0xff] %vm1424_vm15, %v2347_v0  ;;  %1442 = vst.msk [vmem:[#allocation4 + $0x80] sm:$0xff] %vm1424_vm15, %v2347_v0 }
  0x88   : > { %v790_v63 = vmul.f32 2.0, %v781_v50  ;;  %v963_v1 = vld [vmem:[#allocation3 + $0x60] sm:$0xff]  ;;  %2188 = vmatprep.subr.mxu0 %v1261_v5  ;;  %1444 = vst.msk [vmem:[#allocation4 + $0x90] sm:$0xff] %vm1424_vm15, %v2347_v0 }
  0x89   : > { %v813_v21 = vmul.f32 0.0625, %v805_v20  ;;  %858 = vst.msk [vmem:[#allocation5 + $0x30] sm:$0xff] %vm367_vm0, %v963_v1  ;;  %1220 = vrot.lane.b32.xlu1 %v2818_v55, %s2355_s26  ;;  %2189 = vmatpush3.msra.mxu0 %v1261_v5  ;;  %v1061_v16 = vld [vmem:[#allocation3 + $0x62] sm:$0xff] }
  0x8a   : > { %v798_v2 = vadd.f32 %v790_v63, %v780_v46  ;;  %1173 = vrot.lane.b32.xlu0 %v2821_v56, %s2354_s10  ;;  %v913_v56 = vld [vmem:[#allocation3 + $0x42] sm:$0xff] }
  0x8b   : > { %842 = vst.msk [vmem:[#allocation3 + $0x71] sm:$0xff] %vm367_vm0, %v813_v21 }
  0x8c   : > { %v806_v4 = vadd.f32 %v798_v2, %v782_v62 }
  0x8d   : > { %1029 = vrot.lane.b32.xlu1 %v1010_v6, %s2351_s5 }
  0x8e   : > { %v814_v7 = vmul.f32 0.0625, %v806_v4  ;;  %884 = vrot.lane.b32.xlu0 %v1010_v6, %s2348_s29 }
  0x8f   : > { %v877_v11 = vpop.permute.xlu0 %876 }
  0x90   : > { %843 = vst.msk [vmem:[#allocation3 + $0x81] sm:$0xff] %vm367_vm0, %v814_v7  ;;  %v926_v12 = vpop.permute.xlu1 %925 }
  0x91   : > { %1222 = vrot.lane.b32.xlu1 %v2848_v28, %s2355_s26  ;;  %901 = vst.msk [vmem:[#allocation5] sm:$0xff] %vm900_vm6, %v877_v11 }
  0x92   : > { %v1111_v55 = vld [vmem:[#allocation3 + $0x70] sm:$0xff]  ;;  %1076 = vrot.lane.b32.xlu0 %v2848_v28, %s2352_s6  ;;  %950 = vst.msk [vmem:[#allocation5] sm:$0xff] %vm949_vm7, %v926_v12 }
  0x93   : > { %859 = vst.msk [vmem:[#allocation5 + $0x38] sm:$0xff] %vm367_vm0, %v1111_v55  ;;  %v867_v15 = vld [vmem:[#allocation3 + $0x71] sm:$0xff]  ;;  %vm1426_vm0 = vcmask 58368  }
  0x94   : > { %v916_v17 = vld [vmem:[#allocation3 + $0x72] sm:$0xff]  ;;  %1431 = vst.msk [vmem:[#allocation4 + $0x28] sm:$0x3] %vm1426_vm0, %v2347_v0  ;;  %1427 = vst.msk [vmem:[#allocation4 + $0x8] sm:$0x3] %vm1426_vm0, %v2347_v0 }
  0x95   : > { %933 = vrot.lane.b32.xlu1 %v913_v56, %s2349_s30  ;;  %1429 = vst.msk [vmem:[#allocation4 + $0x18] sm:$0x3] %vm1426_vm0, %v2347_v0  ;;  %1433 = vst.msk [vmem:[#allocation4 + $0x38] sm:$0x3] %vm1426_vm0, %v2347_v0 }
  0x96   : > { %886 = vrot.lane.b32.xlu0 %v865_v54, %s2348_s29  ;;  %1435 = vst.msk [vmem:[#allocation4 + $0x48] sm:$0x3] %vm1426_vm0, %v2347_v0  ;;  %1437 = vst.msk [vmem:[#allocation4 + $0x58] sm:$0x3] %vm1426_vm0, %v2347_v0 }
  0x97   : > { %v965_v18 = vld [vmem:[#allocation3 + $0x80] sm:$0xff]  ;;  %1439 = vst.msk [vmem:[#allocation4 + $0x68] sm:$0x3] %vm1426_vm0, %v2347_v0  ;;  %1441 = vst.msk [vmem:[#allocation4 + $0x78] sm:$0x3] %vm1426_vm0, %v2347_v0 }
  0x98   : > { %v1014_v19 = vld [vmem:[#allocation3 + $0x81] sm:$0xff]  ;;  %1443 = vst.msk [vmem:[#allocation4 + $0x88] sm:$0x3] %vm1426_vm0, %v2347_v0  ;;  %1445 = vst.msk [vmem:[#allocation4 + $0x98] sm:$0x3] %vm1426_vm0, %v2347_v0  ;;  %vm1806_vm0 = vcmask 523712  }
  0x99   : > { %1126 = vrot.lane.b32.xlu1 %v2831_v44, %s2353_s7  ;;  %v1012_v44 = vld [vmem:[#allocation3 + $0x61] sm:$0xff] }
  0x9a   : > { %1078 = vrot.lane.b32.xlu0 %v913_v56, %s2352_s6  ;;  %v1063_v22 = vld [vmem:[#allocation3 + $0x82] sm:$0xff] }
  0x9d   : > { %982 = vrot.lane.b32.xlu1 %v2845_v23, %s2350_s4 }
  0x9e   : > { %935 = vrot.lane.b32.xlu0 %v914_v8, %s2349_s30 }
  0x9f   : > { %v1773_v0 = vld [vmem:[#allocation4 + $0x91] sm:$0xff] }
  0xa1   : > { %1175 = vrot.lane.b32.xlu1 %v1010_v6, %s2354_s10 }
  0xa2   : > { %1128 = vrot.lane.b32.xlu0 %v2845_v23, %s2353_s7  ;;  %v1113_v23 = vld [vmem:[#allocation3 + $0x90] sm:$0xff] }
  0xa5   : > { %1031 = vrot.lane.b32.xlu1 %v865_v54, %s2351_s5 }
  0xa6   : > { %984 = vrot.lane.b32.xlu0 %v963_v1, %s2350_s4 }
  0xa9   : > { %1224 = vrot.lane.b32.xlu1 %v913_v56, %s2355_s26 }
  0xaa   : > { %1177 = vrot.lane.b32.xlu0 %v865_v54, %s2354_s10 }
  0xad   : > { %1033 = vrot.lane.b32.xlu1 %v1012_v44, %s2351_s5 }
  0xae   : > { %888 = vrot.lane.b32.xlu0 %v1012_v44, %s2348_s29 }
  0xb1   : > { %1226 = vrot.lane.b32.xlu1 %v914_v8, %s2355_s26 }
  0xb2   : > { %1080 = vrot.lane.b32.xlu0 %v914_v8, %s2352_s6 }
  0xb5   : > { %937 = vrot.lane.b32.xlu1 %v1061_v16, %s2349_s30 }
  0xb6   : > { %890 = vrot.lane.b32.xlu0 %v867_v15, %s2348_s29  ;;  %s2356_s29 = smov 48  }
  0xb9   : > { %1130 = vrot.lane.b32.xlu1 %v963_v1, %s2353_s7 }
  0xba   : > { %1082 = vrot.lane.b32.xlu0 %v1061_v16, %s2352_s6 }
  0xbd   : > { %986 = vrot.lane.b32.xlu1 %v1111_v55, %s2350_s4 }
  0xbe   : > { %939 = vrot.lane.b32.xlu0 %v916_v17, %s2349_s30 }
  0xc1   : > { %1179 = vrot.lane.b32.xlu1 %v1012_v44, %s2354_s10 }
  0xc2   : > { %1132 = vrot.lane.b32.xlu0 %v1111_v55, %s2353_s7 }
  0xc5   : > { %1035 = vrot.lane.b32.xlu1 %v867_v15, %s2351_s5 }
  0xc6   : > { %988 = vrot.lane.b32.xlu0 %v965_v18, %s2350_s4  ;;  %s2357_s4 = smov 56  }
  0xc9   : > { %1228 = vrot.lane.b32.xlu1 %v1061_v16, %s2355_s26 }
  0xca   : > { %1181 = vrot.lane.b32.xlu0 %v867_v15, %s2354_s10 }
  0xcd   : > { %1084 = vrot.lane.b32.xlu1 %v916_v17, %s2352_s6 }
  0xce   : > { %1037 = vrot.lane.b32.xlu0 %v1014_v19, %s2351_s5 }
  0xd1   : > { %1086 = vrot.lane.b32.xlu1 %v1063_v22, %s2352_s6  ;;  %s2358_s6 = smov 40  }
  0xd2   : > { %1230 = vrot.lane.b32.xlu0 %v916_v17, %s2355_s26 }
  0xd5   : > { %1136 = vrot.lane.b32.xlu1 %v1113_v23, %s2353_s7 }
  0xd6   : > { %1134 = vrot.lane.b32.xlu0 %v965_v18, %s2353_s7 }
  0xd7   : > { %v928_v24 = vpop.permute.xlu1 %927 }
  0xd8   : > { %v879_v28 = vpop.permute.xlu0 %878 }
  0xd9   : > { %902 = vst.msk [vmem:[#allocation5 + $0x8] sm:$0xff] %vm900_vm6, %v879_v28  ;;  %1185 = vrot.lane.b32.xlu1 %v1162_v13, %s2354_s10 }
  0xda   : > { %951 = vst.msk [vmem:[#allocation5 + $0x8] sm:$0xff] %vm949_vm7, %v928_v24  ;;  %1183 = vrot.lane.b32.xlu0 %v1014_v19, %s2354_s10  ;;  %s2289_s10 = sshll.u32 %s2360_s9, 4  ;;  %s2290_s10 = int_to_ptr.vmem [resolvable:$false] %s2289_s10 }
  0xdb   : > { %v977_v30 = vpop.permute.xlu1 %976  ;;  %s2291_s11 = scalar_lea.vmem %s2290_s10, 2048 }
  0xdc   : > { %v975_v31 = vpop.permute.xlu0 %974  ;;  %1000 = vst.msk [vmem:[#allocation5 + $0x8] sm:$0xff] %vm998_vm8, %v977_v30 }
  0xdd   : > { %999 = vst.msk [vmem:[#allocation5] sm:$0xff] %vm998_vm8, %v975_v31  ;;  %1234 = vrot.lane.b32.xlu1 %v1211_v29, %s2355_s26 }
  0xde   : > { %1232 = vrot.lane.b32.xlu0 %v1063_v22, %s2355_s26 }
  0xdf   : > { %v881_v10 = vpop.permute.xlu1 %880 }
  0xe0   : > { %v1024_v32 = vpop.permute.xlu0 %1023  ;;  %903 = vst.msk [vmem:[#allocation5 + $0x10] sm:$0xff] %vm900_vm6, %v881_v10 }
  0xe1   : > { %1048 = vst.msk [vmem:[#allocation5] sm:$0xff] %vm1047_vm9, %v1024_v32  ;;  %v1724_v32 = vld [vmem:[#allocation4 + $0x90] sm:$0xff] }
  0xe2   : > { %1747 = vrot.lane.b32.xlu1 %v1724_v32, %s2356_s29 }
  0xe3   : > { %v1073_v51 = vpop.permute.xlu1 %1072 }
  0xe4   : > { %v1026_v27 = vpop.permute.xlu0 %1025  ;;  %1097 = vst.msk [vmem:[#allocation5] sm:$0xff] %vm1096_vm10, %v1073_v51  ;;  %v1471_v51 = vld [vmem:[#allocation4 + $0x1] sm:$0xff] }
  0xe5   : > { %1049 = vst.msk [vmem:[#allocation5 + $0x8] sm:$0xff] %vm1047_vm9, %v1026_v27  ;;  %1487 = vrot.lane.b32.xlu0 %v1471_v51, %s2349_s30  ;;  %v1520_v27 = vld [vmem:[#allocation4 + $0x2] sm:$0xff] }
  0xe6   : > { %1796 = vrot.lane.b32.xlu1 %v1773_v0, %s2357_s4 }
  0xe7   : > { %v930_v61 = vpop.permute.xlu1 %929 }
  0xe8   : > { %v883_v33 = vpop.permute.xlu0 %882  ;;  %952 = vst.msk [vmem:[#allocation5 + $0x10] sm:$0xff] %vm949_vm7, %v930_v61 }
  0xe9   : > { %904 = vst.msk [vmem:[#allocation5 + $0x18] sm:$0xff] %vm900_vm6, %v883_v33  ;;  %1536 = vrot.lane.b32.xlu0 %v1520_v27, %s2351_s5 }
  0xeb   : > { %v1123_v35 = vpop.permute.xlu1 %1122 }
  0xec   : > { %v1075_v14 = vpop.permute.xlu0 %1074  ;;  %1147 = vst.msk [vmem:[#allocation5] sm:$0xff] %vm1146_vm11, %v1123_v35  ;;  %v1455_v35 = vld [vmem:[#allocation4] sm:$0xff] }
  0xed   : > { %1098 = vst.msk [vmem:[#allocation5 + $0x8] sm:$0xff] %vm1096_vm10, %v1075_v14 }
  0xee   : > { %1463 = vst.msk [vmem:[#allocation6] sm:$0xff] %vm1424_vm15, %v1455_v35 }
  0xef   : > { %v979_v36 = vpop.permute.xlu1 %978 }
  0xf0   : > { %v932_v37 = vpop.permute.xlu0 %931  ;;  %1001 = vst.msk [vmem:[#allocation5 + $0x10] sm:$0xff] %vm998_vm8, %v979_v36 }
  0xf1   : > { %953 = vst.msk [vmem:[#allocation5 + $0x18] sm:$0xff] %vm949_vm7, %v932_v37 }
  0xf3   : > { %v1172_v45 = vpop.permute.xlu1 %1171 }
  0xf4   : > { %v1125_v9 = vpop.permute.xlu0 %1124  ;;  %1196 = vst.msk [vmem:[#allocation5] sm:$0xff] %vm1195_vm12, %v1172_v45 }
  0xf5   : > { %1148 = vst.msk [vmem:[#allocation5 + $0x8] sm:$0xff] %vm1146_vm11, %v1125_v9 }
  0xf7   : > { %v1028_v38 = vpop.permute.xlu1 %1027 }
  0xf8   : > { %v981_v39 = vpop.permute.xlu0 %980  ;;  %1050 = vst.msk [vmem:[#allocation5 + $0x10] sm:$0xff] %vm1047_vm9, %v1028_v38 }
  0xf9   : > { %1002 = vst.msk [vmem:[#allocation5 + $0x18] sm:$0xff] %vm998_vm8, %v981_v39 }
  0xfb   : > { %v1221_v40 = vpop.permute.xlu1 %1220 }
  0xfc   : > { %v1174_v41 = vpop.permute.xlu0 %1173  ;;  %1245 = vst.msk [vmem:[#allocation5] sm:$0xff] %vm1244_vm13, %v1221_v40 }
  0xfd   : > { %1197 = vst.msk [vmem:[#allocation5 + $0x8] sm:$0xff] %vm1195_vm12, %v1174_v41 }
  0xff   : > { %v1030_v42 = vpop.permute.xlu1 %1029 }
 0x100   : > { %v885_v25 = vpop.permute.xlu0 %884  ;;  %1051 = vst.msk [vmem:[#allocation5 + $0x18] sm:$0xff] %vm1047_vm9, %v1030_v42 }
 0x101   : > { %905 = vst.msk [vmem:[#allocation5 + $0x20] sm:$0xff] %vm900_vm6, %v885_v25 }
 0x103   : > { %v1223_v46 = vpop.permute.xlu1 %1222  ;;  %v1253_v48 = vld [vmem:[#allocation5] sm:$0xff] }
 0x104   : > { %v1077_v47 = vpop.permute.xlu0 %1076  ;;  %1246 = vst.msk [vmem:[#allocation5 + $0x8] sm:$0xff] %vm1244_vm13, %v1223_v46  ;;  %2190 = vmatprep.mubr.msk.f32.mxu0 %vm1266_vm14, %v1253_v48 }
 0x105   : > { %1099 = vst.msk [vmem:[#allocation5 + $0x10] sm:$0xff] %vm1096_vm10, %v1077_v47 }
 0x107   : > { %v934_v26 = vpop.permute.xlu1 %933 }
 0x108   : > { %v887_v49 = vpop.permute.xlu0 %886  ;;  %954 = vst.msk [vmem:[#allocation5 + $0x20] sm:$0xff] %vm949_vm7, %v934_v26 }
 0x109   : > { %906 = vst.msk [vmem:[#allocation5 + $0x28] sm:$0xff] %vm900_vm6, %v887_v49 }
 0x10b   : > { %v1127_v52 = vpop.permute.xlu1 %1126  ;;  %v1254_v34 = vld [vmem:[#allocation5 + $0x8] sm:$0xff] }
 0x10c   : > { %v1079_v53 = vpop.permute.xlu0 %1078  ;;  %1149 = vst.msk [vmem:[#allocation5 + $0x10] sm:$0xff] %vm1146_vm11, %v1127_v52  ;;  %2191 = vmatmul.mubr.msk.f32.vlgmr.msra.gmra.mxu0 %vm1266_vm14, %v1254_v34 }
 0x10d   : > { %1100 = vst.msk [vmem:[#allocation5 + $0x18] sm:$0xff] %vm1096_vm10, %v1079_v53 }
 0x10f   : > { %v983_v57 = vpop.permute.xlu1 %982 }
 0x110   : > { %v936_v59 = vpop.permute.xlu0 %935  ;;  %1003 = vst.msk [vmem:[#allocation5 + $0x20] sm:$0xff] %vm998_vm8, %v983_v57 }
 0x111   : > { %955 = vst.msk [vmem:[#allocation5 + $0x28] sm:$0xff] %vm949_vm7, %v936_v59 }
 0x113   : > { %v1176_v60 = vpop.permute.xlu1 %1175 }
 0x114   : > { %v1129_v50 = vpop.permute.xlu0 %1128  ;;  %1198 = vst.msk [vmem:[#allocation5 + $0x10] sm:$0xff] %vm1195_vm12, %v1176_v60 }
 0x115   : > { %1150 = vst.msk [vmem:[#allocation5 + $0x18] sm:$0xff] %vm1146_vm11, %v1129_v50 }
 0x117   : > { %v1032_v58 = vpop.permute.xlu1 %1031 }
 0x118   : > { %v985_v20 = vpop.permute.xlu0 %984  ;;  %1052 = vst.msk [vmem:[#allocation5 + $0x20] sm:$0xff] %vm1047_vm9, %v1032_v58 }
 0x119   : > { %1004 = vst.msk [vmem:[#allocation5 + $0x28] sm:$0xff] %vm998_vm8, %v985_v20  ;;  %v1880_v20 = vld [vmem:[%s3311_s2 + $0x40] sm:$0xff] }
 0x11a   : > { %2202 = vmatprep.subr.mxu1 %v1880_v20 }
 0x11b   : > { %v1225_v43 = vpop.permute.xlu1 %1224  ;;  %2203 = vmatpush3.msra.mxu1 %v1880_v20 }
 0x11c   : > { %v1178_v62 = vpop.permute.xlu0 %1177  ;;  %1247 = vst.msk [vmem:[#allocation5 + $0x10] sm:$0xff] %vm1244_vm13, %v1225_v43  ;;  %v1879_v43 = vld [vmem:[%s3311_s2 + $0x38] sm:$0xff] }
 0x11d   : > { %1199 = vst.msk [vmem:[#allocation5 + $0x18] sm:$0xff] %vm1195_vm12, %v1178_v62  ;;  %2204 = vmatprep.subr.mxu1 %v1879_v43 }
 0x11e   : > { %2205 = vmatpush3.msra.mxu1 %v1879_v43 }
 0x11f   : > { %v1034_v63 = vpop.permute.xlu1 %1033 }
 0x120   : > { %v889_v1 = vpop.permute.xlu0 %888  ;;  %1053 = vst.msk [vmem:[#allocation5 + $0x28] sm:$0xff] %vm1047_vm9, %v1034_v63  ;;  %v1878_v63 = vld [vmem:[%s3311_s2 + $0x30] sm:$0xff] }
 0x121   : > { %907 = vst.msk [vmem:[#allocation5 + $0x30] sm:$0xff] %vm900_vm6, %v889_v1  ;;  %2206 = vmatprep.subr.mxu1 %v1878_v63  ;;  %v1877_v1 = vld [vmem:[%s3311_s2 + $0x28] sm:$0xff] }
 0x122   : > { %2207 = vmatpush3.msra.mxu1 %v1878_v63 }
 0x123   : > { %v1227_v21 = vpop.permute.xlu1 %1226  ;;  %v1255_v3 = vld [vmem:[#allocation5 + $0x10] sm:$0xff]  ;;  %2208 = vmatprep.subr.mxu1 %v1877_v1 }
 0x124   : > { %v1081_v2 = vpop.permute.xlu0 %1080  ;;  %1248 = vst.msk [vmem:[#allocation5 + $0x18] sm:$0xff] %vm1244_vm13, %v1227_v21  ;;  %2193 = vmatprep.mubr.msk.f32.mxu0 %vm1266_vm14, %v1255_v3  ;;  %2209 = vmatpush3.msra.mxu1 %v1877_v1  ;;  %v1875_v3 = vld [vmem:[%s3311_s2 + $0x18] sm:$0xff] }
 0x125   : > { %1101 = vst.msk [vmem:[#allocation5 + $0x20] sm:$0xff] %vm1096_vm10, %v1081_v2  ;;  %v1876_v2 = vld [vmem:[%s3311_s2 + $0x20] sm:$0xff] }
 0x126   : > { %2210 = vmatprep.subr.mxu1 %v1876_v2 }
 0x127   : > { %v938_v5 = vpop.permute.xlu1 %937  ;;  %2211 = vmatpush3.msra.mxu1 %v1876_v2 }
 0x128   : > { %v891_v4 = vpop.permute.xlu0 %890  ;;  %956 = vst.msk [vmem:[#allocation5 + $0x30] sm:$0xff] %vm949_vm7, %v938_v5  ;;  %2212 = vmatprep.subr.mxu1 %v1875_v3 }
 0x129   : > { %908 = vst.msk [vmem:[#allocation5 + $0x38] sm:$0xff] %vm900_vm6, %v891_v4  ;;  %2213 = vmatpush3.msra.mxu1 %v1875_v3 }
 0x12b   : > { %v1256_v7 = vld [vmem:[#allocation5 + $0x18] sm:$0xff]  ;;  %v1131_v55 = vpop.permute.xlu1 %1130 }
 0x12c   : > { %v1083_v6 = vpop.permute.xlu0 %1082  ;;  %2194 = vmatmul.mubr.msk.f32.gmra.mxu0 %vm1266_vm14, %v1256_v7  ;;  %1151 = vst.msk [vmem:[#allocation5 + $0x20] sm:$0xff] %vm1146_vm11, %v1131_v55  ;;  %v1874_v7 = vld [vmem:[%s3311_s2 + $0x10] sm:$0xff] }
 0x12d   : > { %1102 = vst.msk [vmem:[#allocation5 + $0x28] sm:$0xff] %vm1096_vm10, %v1083_v6  ;;  %2214 = vmatprep.subr.mxu1 %v1874_v7 }
 0x12e   : > { %2215 = vmatpush3.msra.mxu1 %v1874_v7 }
 0x12f   : > { %v987_v54 = vpop.permute.xlu1 %986 }
 0x130   : > { %v940_v56 = vpop.permute.xlu0 %939  ;;  %1005 = vst.msk [vmem:[#allocation5 + $0x30] sm:$0xff] %vm998_vm8, %v987_v54  ;;  %v1873_v54 = vld [vmem:[%s3311_s2 + $0x8] sm:$0xff] }
 0x131   : > { %957 = vst.msk [vmem:[#allocation5 + $0x38] sm:$0xff] %vm949_vm7, %v940_v56  ;;  %2216 = vmatprep.subr.mxu1 %v1873_v54 }
 0x132   : > { %2217 = vmatpush3.msra.mxu1 %v1873_v54 }
 0x133   : > { %v1180_v44 = vpop.permute.xlu1 %1179 }
 0x134   : > { %v1133_v8 = vpop.permute.xlu0 %1132  ;;  %1200 = vst.msk [vmem:[#allocation5 + $0x20] sm:$0xff] %vm1195_vm12, %v1180_v44  ;;  %v1872_v44 = vld [vmem:[%s3311_s2] sm:$0xff] }
 0x135   : > { %1152 = vst.msk [vmem:[#allocation5 + $0x28] sm:$0xff] %vm1146_vm11, %v1133_v8  ;;  %2218 = vmatprep.subr.mxu1 %v1872_v44 }
 0x136   : > { %2219 = vmatpush3.msra.mxu1 %v1872_v44 }
 0x137   : > { %v1036_v12 = vpop.permute.xlu1 %1035 }
 0x138   : > { %v989_v11 = vpop.permute.xlu0 %988  ;;  %1054 = vst.msk [vmem:[#allocation5 + $0x30] sm:$0xff] %vm1047_vm9, %v1036_v12 }
 0x139   : > { %1006 = vst.msk [vmem:[#allocation5 + $0x38] sm:$0xff] %vm998_vm8, %v989_v11 }
 0x13b   : > { %v1229_v16 = vpop.permute.xlu1 %1228 }
 0x13c   : > { %v1182_v15 = vpop.permute.xlu0 %1181  ;;  %1249 = vst.msk [vmem:[#allocation5 + $0x20] sm:$0xff] %vm1244_vm13, %v1229_v16 }
 0x13d   : > { %1201 = vst.msk [vmem:[#allocation5 + $0x28] sm:$0xff] %vm1195_vm12, %v1182_v15 }
 0x13f   : > { %v1085_v18 = vpop.permute.xlu1 %1084 }
 0x140   : > { %v1038_v17 = vpop.permute.xlu0 %1037  ;;  %1103 = vst.msk [vmem:[#allocation5 + $0x30] sm:$0xff] %vm1096_vm10, %v1085_v18 }
 0x141   : > { %1055 = vst.msk [vmem:[#allocation5 + $0x38] sm:$0xff] %vm1047_vm9, %v1038_v17 }
 0x143   : > { %v1257_v22 = vld [vmem:[#allocation5 + $0x20] sm:$0xff]  ;;  %v1087_v23 = vpop.permute.xlu1 %1086 }
 0x144   : > { %v1231_v19 = vpop.permute.xlu0 %1230  ;;  %2196 = vmatprep.mubr.msk.f32.mxu0 %vm1266_vm14, %v1257_v22  ;;  %1104 = vst.msk [vmem:[#allocation5 + $0x38] sm:$0xff] %vm1096_vm10, %v1087_v23 }
 0x145   : > { %1250 = vst.msk [vmem:[#allocation5 + $0x28] sm:$0xff] %vm1244_vm13, %v1231_v19 }
 0x147   : > { %v1137_v24 = vpop.permute.xlu1 %1136 }
 0x148   : > { %v1135_v13 = vpop.permute.xlu0 %1134  ;;  %1154 = vst.msk [vmem:[#allocation5 + $0x38] sm:$0xff] %vm1146_vm11, %v1137_v24 }
 0x149   : > { %1153 = vst.msk [vmem:[#allocation5 + $0x30] sm:$0xff] %vm1146_vm11, %v1135_v13  ;;  %vm1609_vm11 = vcmask 261312  }
 0x14b   : > { %v1186_v30 = vpop.permute.xlu1 %1185 }
 0x14c   : > { %v1258_v28 = vld [vmem:[#allocation5 + $0x28] sm:$0xff]  ;;  %v1184_v29 = vpop.permute.xlu0 %1183  ;;  %1203 = vst.msk [vmem:[#allocation5 + $0x38] sm:$0xff] %vm1195_vm12, %v1186_v30 }
 0x14d   : > { %2197 = vmatmul.mubr.msk.f32.gmra.mxu0 %vm1266_vm14, %v1258_v28  ;;  %1202 = vst.msk [vmem:[#allocation5 + $0x30] sm:$0xff] %vm1195_vm12, %v1184_v29  ;;  %vm1658_vm12 = vcmask 326912  }
 0x14f   : > { %v1235_v10 = vpop.permute.xlu1 %1234 }
 0x150   : > { %v1233_v31 = vpop.permute.xlu0 %1232  ;;  %1252 = vst.msk [vmem:[#allocation5 + $0x38] sm:$0xff] %vm1244_vm13, %v1235_v10 }
 0x151   : > { %1251 = vst.msk [vmem:[#allocation5 + $0x30] sm:$0xff] %vm1244_vm13, %v1233_v31  ;;  %vm1707_vm13 = vcmask 392512  }
 0x154   : > { %v3148_v32 = vpop.permute.xlu1 %1747 }
 0x157   : > { %v1260_v33 = vld [vmem:[#allocation5 + $0x38] sm:$0xff]  ;;  %v1488_v14 = vpop.permute.xlu0 %1487 }
 0x158   : > { %v1259_v61 = vld [vmem:[#allocation5 + $0x30] sm:$0xff]  ;;  %1512 = vst.msk [vmem:[#allocation6] sm:$0xff] %vm1511_vm1, %v1488_v14  ;;  %v3154_v0 = vpop.permute.xlu1 %1796 }
 0x159   : > { %2199 = vmatprep.mubr.msk.f32.mxu0 %vm1266_vm14, %v1259_v61  ;;  %v1822_v61 = vld [vmem:[#allocation4 + $0x92] sm:$0xff] }
 0x15a   : > { %2200 = vmatmul.mubr.msk.f32.gmra.mxu0 %vm1266_vm14, %v1260_v33  ;;  %vm1757_vm14 = vcmask 458112  }
 0x15b   : > { %v1537_v36 = vpop.permute.xlu0 %1536 }
 0x15c   : > { %1561 = vst.msk [vmem:[#allocation6] sm:$0xff] %vm1560_vm2, %v1537_v36 }
 0x1cc   : > { %v2192_v37 = vpop.f32.mrf.mxu0 }
 0x1cd   : > { %vm1401_vm3 = vcmp.ge.f32.partialorder %v2192_v37, 0.0  ;;  %v1409_v45 = vmul.f32 0.01, %v2192_v37 }
 0x1ce   : > { %v1361_v9 = vpop.f32.mrf.mxu0 }
 0x1cf   : > { %v1417_v38 = vsel %vm1401_vm3, %v2192_v37, %v1409_v45  ;;  %vm1400_vm4 = vcmp.ge.f32.partialorder %v1361_v9, 0.0  ;;  %v1408_v39 = vmul.f32 0.01, %v1361_v9  ;;  %vm1855_vm3 = vcmask 589312  }
 0x1d0   : > { %1448 = vst.msk [vmem:[#allocation4 + $0x21] sm:$0xff] %vm1424_vm15, %v1417_v38 }
 0x1d1   : > { %v1416_v40 = vsel %vm1400_vm4, %v1361_v9, %v1408_v39  ;;  %vm1881_vm4 = vcmask 588800  }
 0x1d2   : > { %1447 = vst.msk [vmem:[#allocation4 + $0x11] sm:$0xff] %vm1424_vm15, %v1416_v40 }
 0x1d7   : > { %v1619_v41 = vld [vmem:[#allocation4 + $0x21] sm:$0xff] }
 0x1d8   : > { %v1570_v42 = vld [vmem:[#allocation4 + $0x20] sm:$0xff]  ;;  %1636 = vrot.lane.b32.xlu0 %v1619_v41, %s2355_s26 }
 0x1d9   : > { %1587 = vrot.lane.b32.xlu1 %v1570_v42, %s2353_s7  ;;  %1465 = vst.msk [vmem:[#allocation6 + $0x10] sm:$0xff] %vm1424_vm15, %v1570_v42  ;;  %v1569_v25 = vld [vmem:[#allocation4 + $0x10] sm:$0xff]  ;;  %v1668_v46 = vld [vmem:[#allocation4 + $0x22] sm:$0xff] }
 0x1da   : > { %1464 = vst.msk [vmem:[#allocation6 + $0x8] sm:$0xff] %vm1424_vm15, %v1569_v25  ;;  %v1618_v47 = vld [vmem:[#allocation4 + $0x11] sm:$0xff] }
 0x1db   : > { %v1521_v57 = vld [vmem:[#allocation4 + $0x12] sm:$0xff] }
 0x1dc   : > { %1685 = vrot.lane.b32.xlu0 %v1668_v46, %s2358_s6 }
 0x1dd   : > { %1491 = vrot.lane.b32.xlu1 %v1619_v41, %s2349_s30 }
 0x1e0   : > { %1585 = vrot.lane.b32.xlu0 %v1569_v25, %s2353_s7 }
 0x1e1   : > { %1540 = vrot.lane.b32.xlu1 %v1668_v46, %s2351_s5 }
 0x1e4   : > { %1634 = vrot.lane.b32.xlu0 %v1618_v47, %s2355_s26 }
 0x1e5   : > { %1733 = vrot.lane.b32.xlu1 %v1570_v42, %s2356_s29 }
 0x1e9   : > { %1782 = vrot.lane.b32.xlu1 %v1619_v41, %s2357_s4 }
 0x1ec   : > { %v2195_v48 = vpop.f32.mrf.mxu0 }
 0x1ed   : > { %1831 = vrot.lane.b32.xlu1 %v1668_v46, %s2359_s8  ;;  %vm1403_vm5 = vcmp.ge.f32.partialorder %v2195_v48, 0.0  ;;  %v1411_v26 = vmul.f32 0.01, %v2195_v48 }
 0x1ee   : > { %v1371_v49 = vpop.f32.mrf.mxu0 }
 0x1ef   : > { %v1419_v52 = vsel %vm1403_vm5, %v2195_v48, %v1411_v26  ;;  %vm1402_vm6 = vcmp.ge.f32.partialorder %v1371_v49, 0.0  ;;  %v1410_v53 = vmul.f32 0.01, %v1371_v49 }
 0x1f0   : > { %1450 = vst.msk [vmem:[#allocation4 + $0x41] sm:$0xff] %vm1424_vm15, %v1419_v52 }
 0x1f1   : > { %1489 = vrot.lane.b32.xlu1 %v1618_v47, %s2349_s30  ;;  %v1418_v34 = vsel %vm1402_vm6, %v1371_v49, %v1410_v53 }
 0x1f2   : > { %1449 = vst.msk [vmem:[#allocation4 + $0x31] sm:$0xff] %vm1424_vm15, %v1418_v34 }
 0x1f5   : > { %1538 = vrot.lane.b32.xlu1 %v1521_v57, %s2351_s5 }
 0x1f7   : > { %v1572_v59 = vld [vmem:[#allocation4 + $0x40] sm:$0xff] }
 0x1f8   : > { %1591 = vrot.lane.b32.xlu0 %v1572_v59, %s2353_s7  ;;  %1467 = vst.msk [vmem:[#allocation6 + $0x20] sm:$0xff] %vm1424_vm15, %v1572_v59  ;;  %v1621_v50 = vld [vmem:[#allocation4 + $0x41] sm:$0xff] }
 0x1f9   : > { %1683 = vrot.lane.b32.xlu1 %v1521_v57, %s2358_s6  ;;  %v1718_v60 = vld [vmem:[#allocation4 + $0x30] sm:$0xff]  ;;  %v1524_v58 = vld [vmem:[#allocation4 + $0x42] sm:$0xff] }
 0x1fa   : > { %1466 = vst.msk [vmem:[#allocation6 + $0x18] sm:$0xff] %vm1424_vm15, %v1718_v60  ;;  %v1474_v62 = vld [vmem:[#allocation4 + $0x31] sm:$0xff] }
 0x1fb   : > { %v1523_v21 = vld [vmem:[#allocation4 + $0x32] sm:$0xff] }
 0x1fc   : > { %1495 = vrot.lane.b32.xlu0 %v1621_v50, %s2349_s30 }
 0x1fd   : > { %1640 = vrot.lane.b32.xlu1 %v1621_v50, %s2355_s26 }
 0x200   : > { %1689 = vrot.lane.b32.xlu0 %v1524_v58, %s2358_s6 }
 0x201   : > { %1544 = vrot.lane.b32.xlu1 %v1524_v58, %s2351_s5 }
 0x204   : > { %1493 = vrot.lane.b32.xlu0 %v1474_v62, %s2349_s30 }
 0x205   : > { %1737 = vrot.lane.b32.xlu1 %v1572_v59, %s2356_s29 }
 0x208   : > { %1542 = vrot.lane.b32.xlu0 %v1523_v21, %s2351_s5 }
 0x209   : > { %1786 = vrot.lane.b32.xlu1 %v1621_v50, %s2357_s4 }
 0x20c   : > { %1735 = vrot.lane.b32.xlu0 %v1718_v60, %s2356_s29 }
 0x20d   : > { %1835 = vrot.lane.b32.xlu1 %v1524_v58, %s2359_s8  ;;  %v2198_v4 = vpop.f32.mrf.mxu0 }
 0x20e   : > { %vm1405_vm7 = vcmp.ge.f32.partialorder %v2198_v4, 0.0  ;;  %v1413_v5 = vmul.f32 0.01, %v2198_v4 }
 0x20f   : > { %v1381_v6 = vpop.f32.mrf.mxu0 }
 0x210   : > { %v1421_v55 = vsel %vm1405_vm7, %v2198_v4, %v1413_v5  ;;  %vm1404_vm8 = vcmp.ge.f32.partialorder %v1381_v6, 0.0  ;;  %v1412_v56 = vmul.f32 0.01, %v1381_v6  ;;  %1784 = vrot.lane.b32.xlu0 %v1474_v62, %s2357_s4 }
 0x211   : > { %1452 = vst.msk [vmem:[#allocation4 + $0x61] sm:$0xff] %vm1424_vm15, %v1421_v55  ;;  %1589 = vrot.lane.b32.xlu1 %v1718_v60, %s2353_s7 }
 0x212   : > { %v1420_v8 = vsel %vm1404_vm8, %v1381_v6, %v1412_v56 }
 0x213   : > { %1451 = vst.msk [vmem:[#allocation4 + $0x51] sm:$0xff] %vm1424_vm15, %v1420_v8 }
 0x214   : > { %1687 = vrot.lane.b32.xlu0 %v1523_v21, %s2358_s6 }
 0x215   : > { %1638 = vrot.lane.b32.xlu1 %v1474_v62, %s2355_s26 }
 0x218   : > { %v1574_v11 = vld [vmem:[#allocation4 + $0x60] sm:$0xff] }
 0x219   : > { %1833 = vrot.lane.b32.xlu1 %v1523_v21, %s2359_s8  ;;  %1595 = vrot.lane.b32.xlu0 %v1574_v11, %s2353_s7  ;;  %1469 = vst.msk [vmem:[#allocation6 + $0x30] sm:$0xff] %vm1424_vm15, %v1574_v11  ;;  %v1623_v17 = vld [vmem:[#allocation4 + $0x61] sm:$0xff] }
 0x21a   : > { %v2201_v12 = vpop.f32.mrf.mxu0  ;;  %v1720_v15 = vld [vmem:[#allocation4 + $0x50] sm:$0xff]  ;;  %v1526_v13 = vld [vmem:[#allocation4 + $0x62] sm:$0xff] }
 0x21b   : > { %vm1407_vm9 = vcmp.ge.f32.partialorder %v2201_v12, 0.0  ;;  %v1415_v16 = vmul.f32 0.01, %v2201_v12  ;;  %1468 = vst.msk [vmem:[#allocation6 + $0x28] sm:$0xff] %vm1424_vm15, %v1720_v15  ;;  %v1476_v24 = vld [vmem:[#allocation4 + $0x51] sm:$0xff] }
 0x21c   : > { %v1391_v18 = vpop.f32.mrf.mxu0  ;;  %v1525_v29 = vld [vmem:[#allocation4 + $0x52] sm:$0xff] }
 0x21d   : > { %1644 = vrot.lane.b32.xlu1 %v1623_v17, %s2355_s26  ;;  %1499 = vrot.lane.b32.xlu0 %v1623_v17, %s2349_s30  ;;  %v1423_v19 = vsel %vm1407_vm9, %v2201_v12, %v1415_v16  ;;  %vm1406_vm10 = vcmp.ge.f32.partialorder %v1391_v18, 0.0  ;;  %v1414_v22 = vmul.f32 0.01, %v1391_v18 }
 0x21e   : > { %1454 = vst.msk [vmem:[#allocation4 + $0x81] sm:$0xff] %vm1424_vm15, %v1423_v19 }
 0x21f   : > { %v1422_v23 = vsel %vm1406_vm10, %v1391_v18, %v1414_v22 }
 0x220   : > { %1453 = vst.msk [vmem:[#allocation4 + $0x71] sm:$0xff] %vm1424_vm15, %v1422_v23 }
 0x221   : > { %1548 = vrot.lane.b32.xlu1 %v1526_v13, %s2351_s5  ;;  %1693 = vrot.lane.b32.xlu0 %v1526_v13, %s2358_s6 }
 0x225   : > { %1741 = vrot.lane.b32.xlu1 %v1574_v11, %s2356_s29  ;;  %1497 = vrot.lane.b32.xlu0 %v1476_v24, %s2349_s30  ;;  %v1576_v30 = vld [vmem:[#allocation4 + $0x80] sm:$0xff] }
 0x226   : > { %v1674_v31 = vld [vmem:[#allocation4 + $0x82] sm:$0xff] }
 0x227   : > { %v1575_v28 = vld [vmem:[#allocation4 + $0x70] sm:$0xff]  ;;  %v1625_v10 = vld [vmem:[#allocation4 + $0x81] sm:$0xff] }
 0x228   : > { %1470 = vst.msk [vmem:[#allocation6 + $0x38] sm:$0xff] %vm1424_vm15, %v1575_v28  ;;  %v1624_v51 = vld [vmem:[#allocation4 + $0x71] sm:$0xff] }
 0x229   : > { %1790 = vrot.lane.b32.xlu1 %v1623_v17, %s2357_s4  ;;  %1546 = vrot.lane.b32.xlu0 %v1525_v29, %s2351_s5  ;;  %v1673_v27 = vld [vmem:[#allocation4 + $0x72] sm:$0xff] }
 0x22d   : > { %1839 = vrot.lane.b32.xlu1 %v1526_v13, %s2359_s8  ;;  %1739 = vrot.lane.b32.xlu0 %v1720_v15, %s2356_s29 }
 0x231   : > { %1593 = vrot.lane.b32.xlu1 %v1720_v15, %s2353_s7  ;;  %1788 = vrot.lane.b32.xlu0 %v1476_v24, %s2357_s4 }
 0x235   : > { %1642 = vrot.lane.b32.xlu1 %v1476_v24, %s2355_s26  ;;  %1691 = vrot.lane.b32.xlu0 %v1525_v29, %s2358_s6 }
 0x239   : > { %1837 = vrot.lane.b32.xlu1 %v1525_v29, %s2359_s8  ;;  %1599 = vrot.lane.b32.xlu0 %v1576_v30, %s2353_s7 }
 0x23d   : > { %1697 = vrot.lane.b32.xlu1 %v1674_v31, %s2358_s6  ;;  %1648 = vrot.lane.b32.xlu0 %v1625_v10, %s2355_s26 }
 0x241   : > { %1745 = vrot.lane.b32.xlu0 %v1576_v30, %s2356_s29  ;;  %1597 = vrot.lane.b32.xlu1 %v1575_v28, %s2353_s7 }
 0x245   : > { %1794 = vrot.lane.b32.xlu0 %v1625_v10, %s2357_s4  ;;  %1646 = vrot.lane.b32.xlu1 %v1624_v51, %s2355_s26 }
 0x249   : > { %1695 = vrot.lane.b32.xlu1 %v1673_v27, %s2358_s6  ;;  %1501 = vrot.lane.b32.xlu0 %v1624_v51, %s2349_s30 }
 0x24a   : > { %v1637_v33 = vpop.permute.xlu0 %1636 }
 0x24b   : > { %v1588_v35 = vpop.permute.xlu1 %1587 }
 0x24d   : > { %1550 = vrot.lane.b32.xlu0 %v1673_v27, %s2351_s5  ;;  %1845 = vrot.lane.b32.xlu1 %v1822_v61, %s2359_s8  ;;  %s161_s5 = sand.u32 1, %s2337_s13  }
 0x24e   : > { %v1686_v14 = vpop.permute.xlu0 %1685  ;;  %s2123_s7 = sshll.u32 %s161_s5, 6 }
 0x24f   : > { %v1492_v36 = vpop.permute.xlu1 %1491  ;;  %s3239_s26 = scalar_lea.vmem [#allocation7], %s2123_s7 }
 0x250   : > { %1514 = vst.msk [vmem:[#allocation6 + $0x10] sm:$0xff] %vm1511_vm1, %v1492_v36 }
 0x251   : > { %1743 = vrot.lane.b32.xlu0 %v1575_v28, %s2356_s29  ;;  %s2149_s29 = sshll.u32 %s2403_s16, 10  ;;  %s3268_s16 = scalar_lea.sflag [#allocation8], %s161_s5 }
 0x252   : > { %v1586_v45 = vpop.permute.xlu0 %1585  ;;  %s3258_s27 = scalar_lea.hbm %s3312_s3, %s2149_s29 }
 0x253   : > { %v1541_v37 = vpop.permute.xlu1 %1540  ;;  %1610 = vst.msk [vmem:[#allocation6] sm:$0xff] %vm1609_vm11, %v1586_v45 }
 0x254   : > { %1563 = vst.msk [vmem:[#allocation6 + $0x10] sm:$0xff] %vm1560_vm2, %v1541_v37 }
 0x255   : > { %1792 = vrot.lane.b32.xlu0 %v1624_v51, %s2357_s4  ;;  %s2057_s4 = sshll.u32 %s3239_s26, 4  ;;  %s3262_s4 = int_to_ptr.vmem [resolvable:$true] %s2057_s4 }
 0x256   : > { %v1635_v38 = vpop.permute.xlu0 %1634  ;;  %s2285_s28 = scalar_lea.vmem %s3262_s4, 1024  ;;  %p2292_p0 = scmp.lt.s32.totalorder %s3262_s4, %s2290_s10 }
 0x257   : > { %v1734_v9 = vpop.permute.xlu1 %1733  ;;  %1659 = vst.msk [vmem:[#allocation6] sm:$0xff] %vm1658_vm12, %v1635_v38  ;;  %p2286_p11 = scmp.ne.s32.totalorder %s3262_s4, %s2285_s28  ;;  %p2293_p1 = scmp.lt.s32.totalorder %s2291_s11, %s2285_s28 }
 0x259   : > { %1841 = vrot.lane.b32.xlu0 %v1673_v27, %s2359_s8  ;;  %p2287_p12 = pnand %p2286_p11, %p2420_p5  ;;  %p2294_p2 = por %p2293_p1, %p2292_p0 }
 0x25b   : > { %v1783_v39 = vpop.permute.xlu1 %1782  ;;  %p2288_p13 = pneg %p2287_p12 }
 0x25d   : > { %1843 = vrot.lane.b32.xlu0 %v1674_v31, %s2359_s8  ;;  %p2295_p3 = pnand %p2294_p2, %p2288_p13 }
 0x25f   : > { %v1832_v40 = vpop.permute.xlu1 %1831 }
 0x263   : > { %v1490_v41 = vpop.permute.xlu1 %1489 }
 0x264   : > { %1513 = vst.msk [vmem:[#allocation6 + $0x8] sm:$0xff] %vm1511_vm1, %v1490_v41 }
 0x267   : > { %v1539_v42 = vpop.permute.xlu1 %1538 }
 0x268   : > { %1562 = vst.msk [vmem:[#allocation6 + $0x8] sm:$0xff] %vm1560_vm2, %v1539_v42 }
 0x269   : > { %1611 = vst.msk [vmem:[#allocation6 + $0x8] sm:$0xff] %vm1609_vm11, %v1588_v35 }
 0x26a   : > { %1660 = vst.msk [vmem:[#allocation6 + $0x8] sm:$0xff] %vm1658_vm12, %v1637_v33  ;;  %v1592_v46 = vpop.permute.xlu0 %1591 }
 0x26b   : > { %v1684_v25 = vpop.permute.xlu1 %1683  ;;  %1709 = vst.msk [vmem:[#allocation6 + $0x8] sm:$0xff] %vm1707_vm13, %v1686_v14 }
 0x26c   : > { %1708 = vst.msk [vmem:[#allocation6] sm:$0xff] %vm1707_vm13, %v1684_v25 }
 0x26d   : > { %1758 = vst.msk [vmem:[#allocation6] sm:$0xff] %vm1757_vm14, %v1734_v9 }
 0x26e   : > { %1807 = vst.msk [vmem:[#allocation6] sm:$0xff] %vm1806_vm0, %v1783_v39  ;;  %v1496_v48 = vpop.permute.xlu0 %1495 }
 0x26f   : > { %1856 = vst.msk [vmem:[#allocation6] sm:$0xff] %vm1855_vm3, %v1832_v40  ;;  %v1641_v47 = vpop.permute.xlu1 %1640 }
 0x270   : > { %1516 = vst.msk [vmem:[#allocation6 + $0x20] sm:$0xff] %vm1511_vm1, %v1496_v48 }
 0x272   : > { %v1690_v49 = vpop.permute.xlu0 %1689 }
 0x273   : > { %v1545_v26 = vpop.permute.xlu1 %1544 }
 0x274   : > { %1565 = vst.msk [vmem:[#allocation6 + $0x20] sm:$0xff] %vm1560_vm2, %v1545_v26 }
 0x276   : > { %v1864_v52 = vld [vmem:[#allocation6] sm:$0xff]  ;;  %v1494_v34 = vpop.permute.xlu0 %1493 }
 0x277   : > { %2220 = vmatprep.mubr.msk.f32.mxu1 %vm1881_vm4, %v1864_v52  ;;  %v1738_v53 = vpop.permute.xlu1 %1737  ;;  %1515 = vst.msk [vmem:[#allocation6 + $0x18] sm:$0xff] %vm1511_vm1, %v1494_v34 }
 0x27a   : > { %v1543_v59 = vpop.permute.xlu0 %1542 }
 0x27b   : > { %v1787_v57 = vpop.permute.xlu1 %1786  ;;  %1564 = vst.msk [vmem:[#allocation6 + $0x18] sm:$0xff] %vm1560_vm2, %v1543_v59 }
 0x27c   : > { %1613 = vst.msk [vmem:[#allocation6 + $0x18] sm:$0xff] %vm1609_vm11, %v1592_v46 }
 0x27d   : > { %1662 = vst.msk [vmem:[#allocation6 + $0x18] sm:$0xff] %vm1658_vm12, %v1641_v47 }
 0x27e   : > { %1711 = vst.msk [vmem:[#allocation6 + $0x18] sm:$0xff] %vm1707_vm13, %v1690_v49  ;;  %v1736_v50 = vpop.permute.xlu0 %1735 }
 0x27f   : > { %v1836_v60 = vpop.permute.xlu1 %1835  ;;  %1759 = vst.msk [vmem:[#allocation6 + $0x8] sm:$0xff] %vm1757_vm14, %v1736_v50 }
 0x282   : > { %v1785_v20 = vpop.permute.xlu0 %1784 }
 0x283   : > { %v1590_v58 = vpop.permute.xlu1 %1589  ;;  %1808 = vst.msk [vmem:[#allocation6 + $0x8] sm:$0xff] %vm1806_vm0, %v1785_v20 }
 0x284   : > { %1612 = vst.msk [vmem:[#allocation6 + $0x10] sm:$0xff] %vm1609_vm11, %v1590_v58 }
 0x286   : > { %v1688_v62 = vpop.permute.xlu0 %1687 }
 0x287   : > { %v1639_v43 = vpop.permute.xlu1 %1638 }
 0x288   : > { %1661 = vst.msk [vmem:[#allocation6 + $0x10] sm:$0xff] %vm1658_vm12, %v1639_v43 }
 0x289   : > { %1710 = vst.msk [vmem:[#allocation6 + $0x10] sm:$0xff] %vm1707_vm13, %v1688_v62 }
 0x28a   : > { %1760 = vst.msk [vmem:[#allocation6 + $0x10] sm:$0xff] %vm1757_vm14, %v1738_v53 }
 0x28b   : > { %1809 = vst.msk [vmem:[#allocation6 + $0x10] sm:$0xff] %vm1806_vm0, %v1787_v57  ;;  %v1834_v63 = vpop.permute.xlu1 %1833  ;;  %v1596_v1 = vpop.permute.xlu0 %1595 }
 0x28c   : > { %1858 = vst.msk [vmem:[#allocation6 + $0x10] sm:$0xff] %vm1855_vm3, %v1836_v60  ;;  %1857 = vst.msk [vmem:[#allocation6 + $0x8] sm:$0xff] %vm1855_vm3, %v1834_v63 }
 0x28f   : > { %v1645_v21 = vpop.permute.xlu1 %1644  ;;  %v1500_v2 = vpop.permute.xlu0 %1499 }
 0x290   : > { %1518 = vst.msk [vmem:[#allocation6 + $0x30] sm:$0xff] %vm1511_vm1, %v1500_v2 }
 0x293   : > { %v1549_v3 = vpop.permute.xlu1 %1548  ;;  %v1694_v4 = vpop.permute.xlu0 %1693  ;;  %v1865_v5 = vld [vmem:[#allocation6 + $0x8] sm:$0xff]  ;;  %v1866_v6 = vld [vmem:[#allocation6 + $0x10] sm:$0xff] }
 0x294   : > { %1567 = vst.msk [vmem:[#allocation6 + $0x30] sm:$0xff] %vm1560_vm2, %v1549_v3  ;;  %2221 = vmatmul.mubr.msk.f32.vlgmr.msra.gmra.mxu1 %vm1881_vm4, %v1865_v5 }
 0x295   : > { %2223 = vmatprep.mubr.msk.f32.mxu1 %vm1881_vm4, %v1866_v6 }
 0x297   : > { %v1742_v7 = vpop.permute.xlu1 %1741  ;;  %v1498_v55 = vpop.permute.xlu0 %1497 }
 0x298   : > { %1517 = vst.msk [vmem:[#allocation6 + $0x28] sm:$0xff] %vm1511_vm1, %v1498_v55 }
 0x29b   : > { %v1791_v56 = vpop.permute.xlu1 %1790  ;;  %v1547_v54 = vpop.permute.xlu0 %1546 }
 0x29c   : > { %1566 = vst.msk [vmem:[#allocation6 + $0x28] sm:$0xff] %vm1560_vm2, %v1547_v54 }
 0x29d   : > { %1615 = vst.msk [vmem:[#allocation6 + $0x28] sm:$0xff] %vm1609_vm11, %v1596_v1 }
 0x29e   : > { %1664 = vst.msk [vmem:[#allocation6 + $0x28] sm:$0xff] %vm1658_vm12, %v1645_v21 }
 0x29f   : > { %v1840_v8 = vpop.permute.xlu1 %1839  ;;  %1713 = vst.msk [vmem:[#allocation6 + $0x28] sm:$0xff] %vm1707_vm13, %v1694_v4  ;;  %v1740_v44 = vpop.permute.xlu0 %1739 }
 0x2a0   : > { %1761 = vst.msk [vmem:[#allocation6 + $0x18] sm:$0xff] %vm1757_vm14, %v1740_v44 }
 0x2a3   : > { %v1594_v11 = vpop.permute.xlu1 %1593  ;;  %v1789_v12 = vpop.permute.xlu0 %1788 }
 0x2a4   : > { %1614 = vst.msk [vmem:[#allocation6 + $0x20] sm:$0xff] %vm1609_vm11, %v1594_v11 }
 0x2a5   : > { %1810 = vst.msk [vmem:[#allocation6 + $0x18] sm:$0xff] %vm1806_vm0, %v1789_v12 }
 0x2a7   : > { %v1643_v15 = vpop.permute.xlu1 %1642  ;;  %v1692_v16 = vpop.permute.xlu0 %1691 }
 0x2a8   : > { %1663 = vst.msk [vmem:[#allocation6 + $0x20] sm:$0xff] %vm1658_vm12, %v1643_v15 }
 0x2a9   : > { %1712 = vst.msk [vmem:[#allocation6 + $0x20] sm:$0xff] %vm1707_vm13, %v1692_v16 }
 0x2aa   : > { %1762 = vst.msk [vmem:[#allocation6 + $0x20] sm:$0xff] %vm1757_vm14, %v1742_v7 }
 0x2ab   : > { %1811 = vst.msk [vmem:[#allocation6 + $0x20] sm:$0xff] %vm1806_vm0, %v1791_v56  ;;  %v1838_v17 = vpop.permute.xlu1 %1837  ;;  %v1600_v18 = vpop.permute.xlu0 %1599 }
 0x2ac   : > { %1860 = vst.msk [vmem:[#allocation6 + $0x20] sm:$0xff] %vm1855_vm3, %v1840_v8  ;;  %1859 = vst.msk [vmem:[#allocation6 + $0x18] sm:$0xff] %vm1855_vm3, %v1838_v17 }
 0x2af   : > { %v1698_v19 = vpop.permute.xlu1 %1697  ;;  %v1649_v22 = vpop.permute.xlu0 %1648 }
 0x2b3   : > { %v1746_v23 = vpop.permute.xlu0 %1745  ;;  %v1598_v13 = vpop.permute.xlu1 %1597  ;;  %v1867_v24 = vld [vmem:[#allocation6 + $0x18] sm:$0xff]  ;;  %v1868_v28 = vld [vmem:[#allocation6 + $0x20] sm:$0xff] }
 0x2b4   : > { %1616 = vst.msk [vmem:[#allocation6 + $0x30] sm:$0xff] %vm1609_vm11, %v1598_v13  ;;  %2224 = vmatmul.mubr.msk.f32.gmra.mxu1 %vm1881_vm4, %v1867_v24 }
 0x2b5   : > { %2226 = vmatprep.mubr.msk.f32.mxu1 %vm1881_vm4, %v1868_v28 }
 0x2b7   : > { %v1795_v29 = vpop.permute.xlu0 %1794  ;;  %v1647_v30 = vpop.permute.xlu1 %1646 }
 0x2b8   : > { %1665 = vst.msk [vmem:[#allocation6 + $0x30] sm:$0xff] %vm1658_vm12, %v1647_v30 }
 0x2bb   : > { %v1696_v31 = vpop.permute.xlu1 %1695  ;;  %v1502_v10 = vpop.permute.xlu0 %1501 }
 0x2bc   : > { %1714 = vst.msk [vmem:[#allocation6 + $0x30] sm:$0xff] %vm1707_vm13, %v1696_v31 }
 0x2bd   : > { %1519 = vst.msk [vmem:[#allocation6 + $0x38] sm:$0xff] %vm1511_vm1, %v1502_v10 }
 0x2be   : > { %1764 = vst.msk [vmem:[#allocation6 + $0x30] sm:$0xff] %vm1757_vm14, %v1746_v23 }
 0x2bf   : > { %1813 = vst.msk [vmem:[#allocation6 + $0x30] sm:$0xff] %vm1806_vm0, %v1795_v29  ;;  %v1551_v51 = vpop.permute.xlu0 %1550  ;;  %v1846_v61 = vpop.permute.xlu1 %1845 }
 0x2c0   : > { %1568 = vst.msk [vmem:[#allocation6 + $0x38] sm:$0xff] %vm1560_vm2, %v1551_v51 }
 0x2c1   : > { %1617 = vst.msk [vmem:[#allocation6 + $0x38] sm:$0xff] %vm1609_vm11, %v1600_v18 }
 0x2c2   : > { %1666 = vst.msk [vmem:[#allocation6 + $0x38] sm:$0xff] %vm1658_vm12, %v1649_v22 }
 0x2c3   : > { %1715 = vst.msk [vmem:[#allocation6 + $0x38] sm:$0xff] %vm1707_vm13, %v1698_v19  ;;  %v1744_v27 = vpop.permute.xlu0 %1743 }
 0x2c4   : > { %1763 = vst.msk [vmem:[#allocation6 + $0x28] sm:$0xff] %vm1757_vm14, %v1744_v27  ;;  %1765 = vst.msk [vmem:[#allocation6 + $0x38] sm:$0xff] %vm1757_vm14, %v3148_v32 }
 0x2c5   : > { %1814 = vst.msk [vmem:[#allocation6 + $0x38] sm:$0xff] %vm1806_vm0, %v3154_v0 }
 0x2c6   : > { %1863 = vst.msk [vmem:[#allocation6 + $0x38] sm:$0xff] %vm1855_vm3, %v1846_v61 }
 0x2c7   : > { %v1793_v33 = vpop.permute.xlu0 %1792 }
 0x2c8   : > { %1812 = vst.msk [vmem:[#allocation6 + $0x28] sm:$0xff] %vm1806_vm0, %v1793_v33 }
 0x2cb   : > { %v1842_v35 = vpop.permute.xlu0 %1841 }
 0x2cc   : > { %1861 = vst.msk [vmem:[#allocation6 + $0x28] sm:$0xff] %vm1855_vm3, %v1842_v35 }
 0x2cd   : > { %v1871_v37 = vld [vmem:[#allocation6 + $0x38] sm:$0xff] }
 0x2cf   : > { %v1844_v14 = vpop.permute.xlu0 %1843 }
 0x2d0   : > { %1862 = vst.msk [vmem:[#allocation6 + $0x30] sm:$0xff] %vm1855_vm3, %v1844_v14 }
 0x2d3   : > { %v1869_v36 = vld [vmem:[#allocation6 + $0x28] sm:$0xff] }
 0x2d4   : > { %2227 = vmatmul.mubr.msk.f32.gmra.mxu1 %vm1881_vm4, %v1869_v36 }
 0x2d7   : > { %v1870_v32 = vld [vmem:[#allocation6 + $0x30] sm:$0xff] }
 0x2d8   : > { %2229 = vmatprep.mubr.msk.f32.mxu1 %vm1881_vm4, %v1870_v32 }
 0x2d9   : > { %2230 = vmatmul.mubr.msk.f32.gmra.mxu1 %vm1881_vm4, %v1871_v37 }
 0x354   : > { %v2222_v0 = vpop.f32.mrf.mxu1 }
 0x355   : > { %vm2012_vm1 = vcmp.ge.f32.partialorder %v2222_v0, 0.0  ;;  %v2020_v45 = vmul.f32 0.01, %v2222_v0 }
 0x356   : > { %v1972_v9 = vpop.f32.mrf.mxu1 }
 0x357   : > { %v2028_v38 = vsel %vm2012_vm1, %v2222_v0, %v2020_v45  ;;  %vm2011_vm2 = vcmp.ge.f32.partialorder %v1972_v9, 0.0  ;;  %v2019_v39 = vmul.f32 0.01, %v1972_v9 }
 0x358   : > { %2036 = vst.msk [vmem:[%s3239_s26 + $0x8] sm:$0xff] %vm1424_vm15, %v2028_v38 }
 0x359   : > { %v2027_v40 = vsel %vm2011_vm2, %v1972_v9, %v2019_v39 }
 0x35a   : > { %2035 = vst.msk [vmem:[%s3239_s26] sm:$0xff] %vm1424_vm15, %v2027_v40 }
 0x374   : > { %v2225_v41 = vpop.f32.mrf.mxu1 }
 0x375   : > { %vm2014_vm5 = vcmp.ge.f32.partialorder %v2225_v41, 0.0  ;;  %v2022_v42 = vmul.f32 0.01, %v2225_v41 }
 0x376   : > { %v1982_v25 = vpop.f32.mrf.mxu1 }
 0x377   : > { %v2030_v46 = vsel %vm2014_vm5, %v2225_v41, %v2022_v42  ;;  %vm2013_vm6 = vcmp.ge.f32.partialorder %v1982_v25, 0.0  ;;  %v2021_v47 = vmul.f32 0.01, %v1982_v25 }
 0x378   : > { %2038 = vst.msk [vmem:[%s3239_s26 + $0x18] sm:$0xff] %vm1424_vm15, %v2030_v46 }
 0x379   : > { %v2029_v48 = vsel %vm2013_vm6, %v1982_v25, %v2021_v47 }
 0x37a   : > { %2037 = vst.msk [vmem:[%s3239_s26 + $0x10] sm:$0xff] %vm1424_vm15, %v2029_v48 }
 0x394   : > { %v2228_v26 = vpop.f32.mrf.mxu1 }
 0x395   : > { %vm2016_vm7 = vcmp.ge.f32.partialorder %v2228_v26, 0.0  ;;  %v2024_v49 = vmul.f32 0.01, %v2228_v26 }
 0x396   : > { %v1992_v52 = vpop.f32.mrf.mxu1 }
 0x397   : > { %v2032_v53 = vsel %vm2016_vm7, %v2228_v26, %v2024_v49  ;;  %vm2015_vm8 = vcmp.ge.f32.partialorder %v1992_v52, 0.0  ;;  %v2023_v34 = vmul.f32 0.01, %v1992_v52 }
 0x398   : > { %2040 = vst.msk [vmem:[%s3239_s26 + $0x28] sm:$0xff] %vm1424_vm15, %v2032_v53 }
 0x399   : > { %v2031_v57 = vsel %vm2015_vm8, %v1992_v52, %v2023_v34  ;;  %v2231_v59 = vpop.f32.mrf.mxu1 }
 0x39a   : > { %2039 = vst.msk [vmem:[%s3239_s26 + $0x20] sm:$0xff] %vm1424_vm15, %v2031_v57  ;;  %vm2018_vm9 = vcmp.ge.f32.partialorder %v2231_v59, 0.0  ;;  %v2026_v60 = vmul.f32 0.01, %v2231_v59 }
 0x39b   : > { %v2002_v50 = vpop.f32.mrf.mxu1 }
 0x39c   : > { %v2034_v58 = vsel %vm2018_vm9, %v2231_v59, %v2026_v60  ;;  %vm2017_vm10 = vcmp.ge.f32.partialorder %v2002_v50, 0.0  ;;  %v2025_v20 = vmul.f32 0.01, %v2002_v50 }
 0x39d   : > { %2042 = vst.msk [vmem:[%s3239_s26 + $0x38] sm:$0xff] %vm1424_vm15, %v2034_v58 }
 0x39e   : > { %v2033_v43 = vsel %vm2017_vm10, %v2002_v50, %v2025_v20 }
 0x39f   : > { %2041 = vst.msk [vmem:[%s3239_s26 + $0x30] sm:$0xff] %vm1424_vm15, %v2033_v43 }
 0x3a0   : > { %2298 = shalt.err (!%p2295_p3)
}
 0x3a1   : > { %s2299_s17 = scalar_lea.hbm %s3258_s27, 1024  ;;  %s2303_s24 = scalar_lea.hbm %s3312_s3, 2048 }
 0x3a2   : > { %p2300_p4 = scmp.ne.s32.totalorder %s3258_s27, %s2299_s17  ;;  %p2304_p9 = scmp.lt.s32.totalorder %s3258_s27, %s3312_s3 }
 0x3a3   : > { %p2305_p10 = scmp.lt.s32.totalorder %s2303_s24, %s2299_s17 }
 0x3a4   : > { %p2301_p7 = pnand %p2300_p4, %p2420_p5 }
 0x3a5   : > { %p2306_p11 = por %p2305_p10, %p2304_p9 }
 0x3a6   : > { %p2302_p8 = pneg %p2301_p7 }
 0x3a8   : > { %p2307_p12 = pnand %p2306_p11, %p2302_p8 }
 0x3aa   : > { %2310 = shalt.err (!%p2307_p12)
}
 0x3ab   : > { %s2361_s7 = smov 128  }
 0x3ac   : > { %2232 = dma.vmem_to_hbm [thread:$0]  (%p2420_p5), %s3262_s4, 1024, %s3258_s27, %s3268_s16, %s2361_s7, %s2361_s7, %s2349_s30  }
 0x3ad PF: > { %p2238_p13 = scmp.ge.s32.totalorder %s2345_s15, 2  ;;  %s2072_s26 = sand.u32 1, %s2333_s12  }
 0x3ae   : > { %s2073_s29 = scalar_lea.sflag [#allocation8], %s2072_s26 }
 0x3af   : > { %p2235_p0 = pnand %p2238_p13, %p2424_p6 }
 0x3b1   : > { %p2236_p1 = pneg %p2235_p0 }
 0x3b3   : > { %2328 = dma.done.wait (%p2236_p1), %s2073_s29, 1024  }
 0x3b4   : > { %2330 = vsyncadd (%p2236_p1), %s2073_s29, 4294966272  ;;  %p13_p2 = scmp.ge.s32.totalorder %s2407_s18, 4   ;;  %s3315_s12 = smov %s2337_s13 }
 0x3b5   : > { %s3316_s13 = smov %s2341_s14  ;;  %s3317_s14 = smov %s2418_s21 }
 0x3b6   : > { %s3318_s15 = smov %s2407_s18  ;;  %15 = sbr.rel (!%p13_p2) target bundleno = 3 (0x3), region = 123 }
 0x3bb   :  { %2078 = vsyncpa [#allocation8], 1 }
 0x3bc   :  { %2080 = vsyncpa [#allocation8 + $0x1], 1 }

</bundles_post_ra>
